<compile_context>
chip_gen: v6e
topology: v6e:2x2x1
jax: 0.10.0
libtpu: 0.0.40
codegen_flags: <defaults>
</compile_context>

<pallas_src>
import numpy as np

import jax
import jax.numpy as jnp
from jax import lax
from jax.experimental import pallas as pl
from jax.experimental.pallas import tpu as pltpu


LANE = 128  # TPU lane width


# ---------------------------------------------------------------------------
# Fused forward kernel: one grid step == one image.
# ---------------------------------------------------------------------------
def _fused_convnet_kernel(x_ref, w1_ref, b1_ref, w2_ref, b2_ref,
                          wf1_ref, bf1_ref, wf2_ref, bf2_ref, wf3_ref, bf3_ref,
                          out_ref, p1_scr, p2_scr):
    f32, bf16 = jnp.float32, jnp.bfloat16

    cin1, k1, _, w1cols = w1_ref.shape        # (3, 5, 32, 256)
    half = w1cols // 2                        # 128
    h_in = x_ref.shape[2]                     # 32
    oh1 = h_in - k1 + 1                       # 28 conv1 output rows
    ph1 = oh1 // 2                            # 14 rows after pool1
    k2 = w2_ref.shape[0]                      # 5
    oh2 = ph1 - k2 + 1                        # 10 conv2 output rows
    ph2 = oh2 // 2                            # 5 rows after pool2

    def pool_rows(x, n_out):
        # max over row pairs (2r, 2r+1) via exact 0/1 selection matmuls
        # (only iota / where / MXU dots -- no strided slicing needed).
        n_in = x.shape[0]
        r = lax.broadcasted_iota(jnp.int32, (n_out, n_in), 0)
        c = lax.broadcasted_iota(jnp.int32, (n_out, n_in), 1)
        even = jnp.dot(jnp.where(c == 2 * r, 1.0, 0.0), x,
                       preferred_element_type=f32)
        odd = jnp.dot(jnp.where(c == 2 * r + 1, 1.0, 0.0), x,
                      preferred_element_type=f32)
        return jnp.maximum(even, odd)

    # ---- conv1 + bias + ReLU + 2x2 maxpool  (3x32x32 -> 14x14x6) -----------
    acc1 = jnp.zeros((oh1, 2 * half), f32)
    for c in range(cin1):
        for i in range(k1):
            lhs = x_ref[0, c, pl.ds(i, oh1), :].astype(bf16)      # (28, 32)
            acc1 = acc1 + jnp.dot(lhs, w1_ref[c, i],
                                  preferred_element_type=f32)     # (28, 256)
    acc1 = jnp.maximum(acc1 + b1_ref[...], 0.0)
    colmax1 = jnp.maximum(acc1[:, :half], acc1[:, half:])         # (28, 128)
    p1_scr[...] = pool_rows(colmax1, ph1)                         # (14, 128)

    # ---- conv2 + bias + ReLU + 2x2 maxpool  (6x14x14 -> 5x5x16) ------------
    acc2 = jnp.zeros((oh2, 2 * half), f32)
    for i in range(k2):
        lhs = p1_scr[pl.ds(i, oh2), :].astype(bf16)               # (10, 128)
        acc2 = acc2 + jnp.dot(lhs, w2_ref[i], preferred_element_type=f32)
    acc2 = jnp.maximum(acc2 + b2_ref[...], 0.0)
    colmax2 = jnp.maximum(acc2[:, :half], acc2[:, half:])         # (10, 128)
    p2_scr[...] = pool_rows(colmax2, ph2)                         # (5, 128)

    # ---- classifier: fc1 + ReLU, fc2 + ReLU, fc3 ----------------------------
    nf1 = wf1_ref.shape[2]
    h = jnp.zeros((1, nf1), f32)
    for r in range(ph2):                                          # 400 = 5 x 80(+pad)
        h = h + jnp.dot(p2_scr[pl.ds(r, 1), :].astype(bf16), wf1_ref[r],
                        preferred_element_type=f32)
    h = jnp.maximum(h + bf1_ref[...], 0.0)
    h = jnp.dot(h.astype(bf16), wf2_ref[...], preferred_element_type=f32)
    h = jnp.maximum(h + bf2_ref[...], 0.0)
    h = jnp.dot(h.astype(bf16), wf3_ref[...], preferred_element_type=f32)
    out_ref[0] = h + bf3_ref[...]


# ---------------------------------------------------------------------------
# Host-side parameter packing (done once at init, plain numpy).
# ---------------------------------------------------------------------------
def prepare_params(p, lane=LANE):
    w1 = np.asarray(p["conv1_w"], np.float32)   # (6, 3, 5, 5)  OIHW
    b1 = np.asarray(p["conv1_b"], np.float32)
    w2 = np.asarray(p["conv2_w"], np.float32)   # (16, 6, 5, 5)
    b2 = np.asarray(p["conv2_b"], np.float32)
    f1 = np.asarray(p["fc1_w"], np.float32)     # (120, 400)
    f2 = np.asarray(p["fc2_w"], np.float32)     # (84, 120)
    f3 = np.asarray(p["fc3_w"], np.float32)     # (cls_out, 84)

    cout1, cin1, k, _ = w1.shape
    cout2, cin2, k2, _ = w2.shape
    h_in = 32
    oh1 = h_in - k + 1          # 28
    e1 = oh1 // 2               # 14 pooled width after conv1
    oh2 = e1 - k2 + 1           # 10
    e2 = oh2 // 2               # 5 pooled width after conv2
    assert oh1 % 2 == 0 and oh2 % 2 == 0
    assert e1 * cout1 <= lane and e1 * cin2 <= lane and e2 * cout2 <= lane
    assert f1.shape[1] == cout2 * e2 * e2

    # conv1 taps: map one raw input row (32 lanes, NCHW channel plane) to one
    # conv-output row; even/odd output columns live in separate 128-lane halves.
    w1p = np.zeros((cin1, k, h_in, 2 * lane), np.float32)
    for c in range(cin1):
        for i in range(k):
            for e in range(e1):
                for j in range(k):
                    w1p[c, i, 2 * e + j, e * cout1:(e + 1) * cout1] = w1[:, c, i, j]
                    w1p[c, i, 2 * e + 1 + j,
                        lane + e * cout1:lane + (e + 1) * cout1] = w1[:, c, i, j]

    b1p = np.zeros((1, 2 * lane), np.float32)
    for e in range(e1):
        b1p[0, e * cout1:(e + 1) * cout1] = b1
        b1p[0, lane + e * cout1:lane + (e + 1) * cout1] = b1

    # conv2 taps: input lanes are pooled1's (w, c) = w*cin2 + c, zero-padded to 128.
    w2p = np.zeros((k2, lane, 2 * lane), np.float32)
    for i in range(k2):
        for e in range(e2):
            for j in range(k2):
                for c in range(cin2):
                    w2p[i, (2 * e + j) * cin2 + c,
                        e * cout2:(e + 1) * cout2] = w2[:, c, i, j]
                    w2p[i, (2 * e + 1 + j) * cin2 + c,
                        lane + e * cout2:lane + (e + 1) * cout2] = w2[:, c, i, j]

    b2p = np.zeros((1, 2 * lane), np.float32)
    for e in range(e2):
        b2p[0, e * cout2:(e + 1) * cout2] = b2
        b2p[0, lane + e * cout2:lane + (e + 1) * cout2] = b2

    # fc1: fold PyTorch's NCHW flatten order (c*25 + h*5 + w) and the weight
    # transpose into a (h, 128, 120) tensor indexed by pooled2's on-chip layout.
    nf1 = f1.shape[0]
    f1p = np.zeros((e2, lane, nf1), np.float32)
    for hh in range(e2):
        for ww in range(e2):
            for c in range(cout2):
                f1p[hh, ww * cout2 + c, :] = f1[:, c * e2 * e2 + hh * e2 + ww]

    bf16 = jnp.bfloat16
    return {
        "w1": jnp.asarray(w1p, bf16), "b1": jnp.asarray(b1p, jnp.float32),
        "w2": jnp.asarray(w2p, bf16), "b2": jnp.asarray(b2p, jnp.float32),
        "wf1": jnp.asarray(f1p, bf16),
        "bf1": jnp.asarray(np.asarray(p["fc1_b"], np.float32)[None, :]),
        "wf2": jnp.asarray(f2.T, bf16),
        "bf2": jnp.asarray(np.asarray(p["fc2_b"], np.float32)[None, :]),
        "wf3": jnp.asarray(f3.T, bf16),
        "bf3": jnp.asarray(np.asarray(p["fc3_b"], np.float32)[None, :]),
    }


# ---------------------------------------------------------------------------
# Fused forward wrapper
# ---------------------------------------------------------------------------
def _const_index_map(ndim):
    zeros = (0,) * ndim
    return lambda b: zeros


def simple_convnet_forward(x_nchw, kp):
    """Fused forward pass. x_nchw: (B, 3, 32, 32) f32 in PyTorch NCHW layout."""
    B = x_nchw.shape[0]
    cls_out = kp["wf3"].shape[1]
    lane = kp["w1"].shape[3] // 2
    k1 = kp["w1"].shape[1]
    ph1 = (x_nchw.shape[2] - k1 + 1) // 2     # 14
    ph2 = kp["wf1"].shape[0]                  # 5

    names = ("w1", "b1", "w2", "b2", "wf1", "bf1", "wf2", "bf2", "wf3", "bf3")
    weight_ops = [kp[n] for n in names]

    in_specs = [pl.BlockSpec((1,) + tuple(x_nchw.shape[1:]),
                             lambda b: (b, 0, 0, 0))]
    in_specs += [pl.BlockSpec(tuple(w.shape), _const_index_map(w.ndim))
                 for w in weight_ops]

    out = pl.pallas_call(
        _fused_convnet_kernel,
        grid=(B,),
        in_specs=in_specs,
        out_specs=pl.BlockSpec((1, 1, cls_out), lambda b: (b, 0, 0)),
        out_shape=jax.ShapeDtypeStruct((B, 1, cls_out), jnp.float32),
        scratch_shapes=[pltpu.VMEM((ph1, lane), jnp.float32),
                        pltpu.VMEM((ph2, lane), jnp.float32)],
        compiler_params=pltpu.CompilerParams(
            dimension_semantics=("parallel",)),
    )(x_nchw.astype(jnp.float32), *weight_ops)
    return out.reshape(B, cls_out)


# ---------------------------------------------------------------------------
# Pure-JAX reference (PyTorch semantics) for verification
# ---------------------------------------------------------------------------
def reference_forward(x_nchw, params):
    def conv_block(x, w, b):
        y = lax.conv_general_dilated(
            x, w, window_strides=(1, 1), padding="VALID",
            dimension_numbers=("NCHW", "OIHW", "NCHW"))
        y = jnp.maximum(y + b[None, :, None, None], 0.0)
        return lax.reduce_window(y, -jnp.inf, lax.max,
                                 (1, 1, 2, 2), (1, 1, 2, 2), "VALID")

    x = conv_block(x_nchw, params["conv1_w"], params["conv1_b"])
    x = conv_block(x, params["conv2_w"], params["conv2_b"])
    x = x.reshape(x.shape[0], -1)
    x = jnp.maximum(x @ params["fc1_w"].T + params["fc1_b"], 0.0)
    x = jnp.maximum(x @ params["fc2_w"].T + params["fc2_b"], 0.0)
    return x @ params["fc3_w"].T + params["fc3_b"]


# ---------------------------------------------------------------------------
# Deterministic parameter init (shapes from simpleConvNet defaults, cls_out=10)
# ---------------------------------------------------------------------------
def init_params(key, cls_out=10):
    ks = jax.random.split(key, 10)
    p = {}
    p["conv1_w"] = jax.random.normal(ks[0], (6, 3, 5, 5), jnp.float32) * 0.10
    p["conv1_b"] = jax.random.normal(ks[1], (6,), jnp.float32) * 0.01
    p["conv2_w"] = jax.random.normal(ks[2], (16, 6, 5, 5), jnp.float32) * 0.10
    p["conv2_b"] = jax.random.normal(ks[3], (16,), jnp.float32) * 0.01
    p["fc1_w"] = jax.random.normal(ks[4], (120, 16 * 5 * 5), jnp.float32) * 0.05
    p["fc1_b"] = jax.random.normal(ks[5], (120,), jnp.float32) * 0.01
    p["fc2_w"] = jax.random.normal(ks[6], (84, 120), jnp.float32) * 0.05
    p["fc2_b"] = jax.random.normal(ks[7], (84,), jnp.float32) * 0.01
    p["fc3_w"] = jax.random.normal(ks[8], (cls_out, 84), jnp.float32) * 0.05
    p["fc3_b"] = jax.random.normal(ks[9], (cls_out,), jnp.float32) * 0.01
    return p


if __name__ == "__main__":
    key = jax.random.PRNGKey(0)
    k_x, k_p = jax.random.split(key)

    cls_out = 10
    raw_params = init_params(k_p, cls_out=cls_out)
    kernel_params = prepare_params(raw_params)
    # fc1 expects 16*5*5 = 400 features -> input spatial must be 32x32
    x = jax.random.normal(k_x, (2, 3, 32, 32), jnp.float32)

    fwd = jax.jit(simple_convnet_forward)
    out = jax.block_until_ready(fwd(x, kernel_params))
    assert out.shape == (2, cls_out), out.shape

    ref = reference_forward(x, raw_params)
    max_err = float(jnp.max(jnp.abs(out - ref)))
    assert jnp.allclose(out, ref, rtol=3e-2, atol=3e-2), f"max err {max_err}"

    print("KERNEL_OK")
</pallas_src>

<mosaic_0001>
module attributes {stable_mosaic.version = 11 : i64} {
  func.func @_fused_convnet_kernel(%arg0: i32, %arg1: memref<1x3x32x32xf32, #tpu.memory_space<vmem>>, %arg2: memref<3x5x32x256xbf16, #tpu.memory_space<vmem>>, %arg3: memref<1x256xf32, #tpu.memory_space<vmem>>, %arg4: memref<5x128x256xbf16, #tpu.memory_space<vmem>>, %arg5: memref<1x256xf32, #tpu.memory_space<vmem>>, %arg6: memref<5x128x120xbf16, #tpu.memory_space<vmem>>, %arg7: memref<1x120xf32, #tpu.memory_space<vmem>>, %arg8: memref<120x84xbf16, #tpu.memory_space<vmem>>, %arg9: memref<1x84xf32, #tpu.memory_space<vmem>>, %arg10: memref<84x10xbf16, #tpu.memory_space<vmem>>, %arg11: memref<1x10xf32, #tpu.memory_space<vmem>>, %arg12: memref<1x1x10xf32, #tpu.memory_space<vmem>>, %arg13: memref<14x128xf32, #tpu.memory_space<vmem>>, %arg14: memref<5x128xf32, #tpu.memory_space<vmem>>) attributes {dimension_semantics = [#tpu.dimension_semantics<parallel>], iteration_bounds = array<i64: 2>, scalar_prefetch = 0 : i64, scratch_operands = 2 : i64, tpu.core_type = #tpu.core_type<tc>, window_params = [{transform_indices = @transform_0, window_bounds = array<i64: 1, 3, 32, 32>}, {pipeline_mode = #tpu.pipeline_mode<synchronous>, transform_indices = @transform_1, window_bounds = array<i64: 3, 5, 32, 256>}, {pipeline_mode = #tpu.pipeline_mode<synchronous>, transform_indices = @transform_2, window_bounds = array<i64: 1, 256>}, {pipeline_mode = #tpu.pipeline_mode<synchronous>, transform_indices = @transform_3, window_bounds = array<i64: 5, 128, 256>}, {pipeline_mode = #tpu.pipeline_mode<synchronous>, transform_indices = @transform_4, window_bounds = array<i64: 1, 256>}, {pipeline_mode = #tpu.pipeline_mode<synchronous>, transform_indices = @transform_5, window_bounds = array<i64: 5, 128, 120>}, {pipeline_mode = #tpu.pipeline_mode<synchronous>, transform_indices = @transform_6, window_bounds = array<i64: 1, 120>}, {pipeline_mode = #tpu.pipeline_mode<synchronous>, transform_indices = @transform_7, window_bounds = array<i64: 120, 84>}, {pipeline_mode = #tpu.pipeline_mode<synchronous>, transform_indices = @transform_8, window_bounds = array<i64: 1, 84>}, {pipeline_mode = #tpu.pipeline_mode<synchronous>, transform_indices = @transform_9, window_bounds = array<i64: 84, 10>}, {pipeline_mode = #tpu.pipeline_mode<synchronous>, transform_indices = @transform_10, window_bounds = array<i64: 1, 10>}, {transform_indices = @transform_11, window_bounds = array<i64: 1, 1, 10>}]} {
    %cst = arith.constant 0.000000e+00 : f32
    %0 = vector.broadcast %cst : f32 to vector<28x256xf32>
    %c0 = arith.constant 0 : index
    %c0_0 = arith.constant 0 : index
    %c0_1 = arith.constant 0 : index
    %c0_2 = arith.constant 0 : index
    %1 = vector.load %arg1[%c0, %c0_0, %c0_1, %c0_2] : memref<1x3x32x32xf32, #tpu.memory_space<vmem>>, vector<1x1x28x32xf32>
    %2 = vector.shape_cast %1 : vector<1x1x28x32xf32> to vector<28x32xf32>
    %3 = arith.truncf %2 : vector<28x32xf32> to vector<28x32xbf16>
    %c0_3 = arith.constant 0 : index
    %c0_4 = arith.constant 0 : index
    %c0_5 = arith.constant 0 : index
    %c0_6 = arith.constant 0 : index
    %4 = vector.load %arg2[%c0_3, %c0_4, %c0_5, %c0_6] : memref<3x5x32x256xbf16, #tpu.memory_space<vmem>>, vector<1x1x32x256xbf16>
    %5 = vector.shape_cast %4 : vector<1x1x32x256xbf16> to vector<32x256xbf16>
    %cst_7 = arith.constant dense<0.000000e+00> : vector<28x256xf32>
    %6 = tpu.matmul %3, %5, %cst_7 {dimension_numbers = #tpu.dot_dimension_numbers<[1], [0], [0], [1], [0, 0, 1, 1], [], []>} : vector<28x32xbf16>, vector<32x256xbf16>, vector<28x256xf32> -> vector<28x256xf32>
    %7 = arith.addf %0, %6 : vector<28x256xf32>
    %c0_8 = arith.constant 0 : index
    %c0_9 = arith.constant 0 : index
    %c1 = arith.constant 1 : index
    %c0_10 = arith.constant 0 : index
    %8 = vector.load %arg1[%c0_8, %c0_9, %c1, %c0_10] : memref<1x3x32x32xf32, #tpu.memory_space<vmem>>, vector<1x1x28x32xf32>
    %9 = vector.shape_cast %8 : vector<1x1x28x32xf32> to vector<28x32xf32>
    %10 = arith.truncf %9 : vector<28x32xf32> to vector<28x32xbf16>
    %c0_11 = arith.constant 0 : index
    %c1_12 = arith.constant 1 : index
    %c0_13 = arith.constant 0 : index
    %c0_14 = arith.constant 0 : index
    %11 = vector.load %arg2[%c0_11, %c1_12, %c0_13, %c0_14] : memref<3x5x32x256xbf16, #tpu.memory_space<vmem>>, vector<1x1x32x256xbf16>
    %12 = vector.shape_cast %11 : vector<1x1x32x256xbf16> to vector<32x256xbf16>
    %cst_15 = arith.constant dense<0.000000e+00> : vector<28x256xf32>
    %13 = tpu.matmul %10, %12, %cst_15 {dimension_numbers = #tpu.dot_dimension_numbers<[1], [0], [0], [1], [0, 0, 1, 1], [], []>} : vector<28x32xbf16>, vector<32x256xbf16>, vector<28x256xf32> -> vector<28x256xf32>
    %14 = arith.addf %7, %13 : vector<28x256xf32>
    %c0_16 = arith.constant 0 : index
    %c0_17 = arith.constant 0 : index
    %c2 = arith.constant 2 : index
    %c0_18 = arith.constant 0 : index
    %15 = vector.load %arg1[%c0_16, %c0_17, %c2, %c0_18] : memref<1x3x32x32xf32, #tpu.memory_space<vmem>>, vector<1x1x28x32xf32>
    %16 = vector.shape_cast %15 : vector<1x1x28x32xf32> to vector<28x32xf32>
    %17 = arith.truncf %16 : vector<28x32xf32> to vector<28x32xbf16>
    %c0_19 = arith.constant 0 : index
    %c2_20 = arith.constant 2 : index
    %c0_21 = arith.constant 0 : index
    %c0_22 = arith.constant 0 : index
    %18 = vector.load %arg2[%c0_19, %c2_20, %c0_21, %c0_22] : memref<3x5x32x256xbf16, #tpu.memory_space<vmem>>, vector<1x1x32x256xbf16>
    %19 = vector.shape_cast %18 : vector<1x1x32x256xbf16> to vector<32x256xbf16>
    %cst_23 = arith.constant dense<0.000000e+00> : vector<28x256xf32>
    %20 = tpu.matmul %17, %19, %cst_23 {dimension_numbers = #tpu.dot_dimension_numbers<[1], [0], [0], [1], [0, 0, 1, 1], [], []>} : vector<28x32xbf16>, vector<32x256xbf16>, vector<28x256xf32> -> vector<28x256xf32>
    %21 = arith.addf %14, %20 : vector<28x256xf32>
    %c0_24 = arith.constant 0 : index
    %c0_25 = arith.constant 0 : index
    %c3 = arith.constant 3 : index
    %c0_26 = arith.constant 0 : index
    %22 = vector.load %arg1[%c0_24, %c0_25, %c3, %c0_26] : memref<1x3x32x32xf32, #tpu.memory_space<vmem>>, vector<1x1x28x32xf32>
    %23 = vector.shape_cast %22 : vector<1x1x28x32xf32> to vector<28x32xf32>
    %24 = arith.truncf %23 : vector<28x32xf32> to vector<28x32xbf16>
    %c0_27 = arith.constant 0 : index
    %c3_28 = arith.constant 3 : index
    %c0_29 = arith.constant 0 : index
    %c0_30 = arith.constant 0 : index
    %25 = vector.load %arg2[%c0_27, %c3_28, %c0_29, %c0_30] : memref<3x5x32x256xbf16, #tpu.memory_space<vmem>>, vector<1x1x32x256xbf16>
    %26 = vector.shape_cast %25 : vector<1x1x32x256xbf16> to vector<32x256xbf16>
    %cst_31 = arith.constant dense<0.000000e+00> : vector<28x256xf32>
    %27 = tpu.matmul %24, %26, %cst_31 {dimension_numbers = #tpu.dot_dimension_numbers<[1], [0], [0], [1], [0, 0, 1, 1], [], []>} : vector<28x32xbf16>, vector<32x256xbf16>, vector<28x256xf32> -> vector<28x256xf32>
    %28 = arith.addf %21, %27 : vector<28x256xf32>
    %c0_32 = arith.constant 0 : index
    %c0_33 = arith.constant 0 : index
    %c4 = arith.constant 4 : index
    %c0_34 = arith.constant 0 : index
    %29 = vector.load %arg1[%c0_32, %c0_33, %c4, %c0_34] : memref<1x3x32x32xf32, #tpu.memory_space<vmem>>, vector<1x1x28x32xf32>
    %30 = vector.shape_cast %29 : vector<1x1x28x32xf32> to vector<28x32xf32>
    %31 = arith.truncf %30 : vector<28x32xf32> to vector<28x32xbf16>
    %c0_35 = arith.constant 0 : index
    %c4_36 = arith.constant 4 : index
    %c0_37 = arith.constant 0 : index
    %c0_38 = arith.constant 0 : index
    %32 = vector.load %arg2[%c0_35, %c4_36, %c0_37, %c0_38] : memref<3x5x32x256xbf16, #tpu.memory_space<vmem>>, vector<1x1x32x256xbf16>
    %33 = vector.shape_cast %32 : vector<1x1x32x256xbf16> to vector<32x256xbf16>
    %cst_39 = arith.constant dense<0.000000e+00> : vector<28x256xf32>
    %34 = tpu.matmul %31, %33, %cst_39 {dimension_numbers = #tpu.dot_dimension_numbers<[1], [0], [0], [1], [0, 0, 1, 1], [], []>} : vector<28x32xbf16>, vector<32x256xbf16>, vector<28x256xf32> -> vector<28x256xf32>
    %35 = arith.addf %28, %34 : vector<28x256xf32>
    %c0_40 = arith.constant 0 : index
    %c1_41 = arith.constant 1 : index
    %c0_42 = arith.constant 0 : index
    %c0_43 = arith.constant 0 : index
    %36 = vector.load %arg1[%c0_40, %c1_41, %c0_42, %c0_43] : memref<1x3x32x32xf32, #tpu.memory_space<vmem>>, vector<1x1x28x32xf32>
    %37 = vector.shape_cast %36 : vector<1x1x28x32xf32> to vector<28x32xf32>
    %38 = arith.truncf %37 : vector<28x32xf32> to vector<28x32xbf16>
    %c1_44 = arith.constant 1 : index
    %c0_45 = arith.constant 0 : index
    %c0_46 = arith.constant 0 : index
    %c0_47 = arith.constant 0 : index
    %39 = vector.load %arg2[%c1_44, %c0_45, %c0_46, %c0_47] : memref<3x5x32x256xbf16, #tpu.memory_space<vmem>>, vector<1x1x32x256xbf16>
    %40 = vector.shape_cast %39 : vector<1x1x32x256xbf16> to vector<32x256xbf16>
    %cst_48 = arith.constant dense<0.000000e+00> : vector<28x256xf32>
    %41 = tpu.matmul %38, %40, %cst_48 {dimension_numbers = #tpu.dot_dimension_numbers<[1], [0], [0], [1], [0, 0, 1, 1], [], []>} : vector<28x32xbf16>, vector<32x256xbf16>, vector<28x256xf32> -> vector<28x256xf32>
    %42 = arith.addf %35, %41 : vector<28x256xf32>
    %c0_49 = arith.constant 0 : index
    %c1_50 = arith.constant 1 : index
    %c1_51 = arith.constant 1 : index
    %c0_52 = arith.constant 0 : index
    %43 = vector.load %arg1[%c0_49, %c1_50, %c1_51, %c0_52] : memref<1x3x32x32xf32, #tpu.memory_space<vmem>>, vector<1x1x28x32xf32>
    %44 = vector.shape_cast %43 : vector<1x1x28x32xf32> to vector<28x32xf32>
    %45 = arith.truncf %44 : vector<28x32xf32> to vector<28x32xbf16>
    %c1_53 = arith.constant 1 : index
    %c1_54 = arith.constant 1 : index
    %c0_55 = arith.constant 0 : index
    %c0_56 = arith.constant 0 : index
    %46 = vector.load %arg2[%c1_53, %c1_54, %c0_55, %c0_56] : memref<3x5x32x256xbf16, #tpu.memory_space<vmem>>, vector<1x1x32x256xbf16>
    %47 = vector.shape_cast %46 : vector<1x1x32x256xbf16> to vector<32x256xbf16>
    %cst_57 = arith.constant dense<0.000000e+00> : vector<28x256xf32>
    %48 = tpu.matmul %45, %47, %cst_57 {dimension_numbers = #tpu.dot_dimension_numbers<[1], [0], [0], [1], [0, 0, 1, 1], [], []>} : vector<28x32xbf16>, vector<32x256xbf16>, vector<28x256xf32> -> vector<28x256xf32>
    %49 = arith.addf %42, %48 : vector<28x256xf32>
    %c0_58 = arith.constant 0 : index
    %c1_59 = arith.constant 1 : index
    %c2_60 = arith.constant 2 : index
    %c0_61 = arith.constant 0 : index
    %50 = vector.load %arg1[%c0_58, %c1_59, %c2_60, %c0_61] : memref<1x3x32x32xf32, #tpu.memory_space<vmem>>, vector<1x1x28x32xf32>
    %51 = vector.shape_cast %50 : vector<1x1x28x32xf32> to vector<28x32xf32>
    %52 = arith.truncf %51 : vector<28x32xf32> to vector<28x32xbf16>
    %c1_62 = arith.constant 1 : index
    %c2_63 = arith.constant 2 : index
    %c0_64 = arith.constant 0 : index
    %c0_65 = arith.constant 0 : index
    %53 = vector.load %arg2[%c1_62, %c2_63, %c0_64, %c0_65] : memref<3x5x32x256xbf16, #tpu.memory_space<vmem>>, vector<1x1x32x256xbf16>
    %54 = vector.shape_cast %53 : vector<1x1x32x256xbf16> to vector<32x256xbf16>
    %cst_66 = arith.constant dense<0.000000e+00> : vector<28x256xf32>
    %55 = tpu.matmul %52, %54, %cst_66 {dimension_numbers = #tpu.dot_dimension_numbers<[1], [0], [0], [1], [0, 0, 1, 1], [], []>} : vector<28x32xbf16>, vector<32x256xbf16>, vector<28x256xf32> -> vector<28x256xf32>
    %56 = arith.addf %49, %55 : vector<28x256xf32>
    %c0_67 = arith.constant 0 : index
    %c1_68 = arith.constant 1 : index
    %c3_69 = arith.constant 3 : index
    %c0_70 = arith.constant 0 : index
    %57 = vector.load %arg1[%c0_67, %c1_68, %c3_69, %c0_70] : memref<1x3x32x32xf32, #tpu.memory_space<vmem>>, vector<1x1x28x32xf32>
    %58 = vector.shape_cast %57 : vector<1x1x28x32xf32> to vector<28x32xf32>
    %59 = arith.truncf %58 : vector<28x32xf32> to vector<28x32xbf16>
    %c1_71 = arith.constant 1 : index
    %c3_72 = arith.constant 3 : index
    %c0_73 = arith.constant 0 : index
    %c0_74 = arith.constant 0 : index
    %60 = vector.load %arg2[%c1_71, %c3_72, %c0_73, %c0_74] : memref<3x5x32x256xbf16, #tpu.memory_space<vmem>>, vector<1x1x32x256xbf16>
    %61 = vector.shape_cast %60 : vector<1x1x32x256xbf16> to vector<32x256xbf16>
    %cst_75 = arith.constant dense<0.000000e+00> : vector<28x256xf32>
    %62 = tpu.matmul %59, %61, %cst_75 {dimension_numbers = #tpu.dot_dimension_numbers<[1], [0], [0], [1], [0, 0, 1, 1], [], []>} : vector<28x32xbf16>, vector<32x256xbf16>, vector<28x256xf32> -> vector<28x256xf32>
    %63 = arith.addf %56, %62 : vector<28x256xf32>
    %c0_76 = arith.constant 0 : index
    %c1_77 = arith.constant 1 : index
    %c4_78 = arith.constant 4 : index
    %c0_79 = arith.constant 0 : index
    %64 = vector.load %arg1[%c0_76, %c1_77, %c4_78, %c0_79] : memref<1x3x32x32xf32, #tpu.memory_space<vmem>>, vector<1x1x28x32xf32>
    %65 = vector.shape_cast %64 : vector<1x1x28x32xf32> to vector<28x32xf32>
    %66 = arith.truncf %65 : vector<28x32xf32> to vector<28x32xbf16>
    %c1_80 = arith.constant 1 : index
    %c4_81 = arith.constant 4 : index
    %c0_82 = arith.constant 0 : index
    %c0_83 = arith.constant 0 : index
    %67 = vector.load %arg2[%c1_80, %c4_81, %c0_82, %c0_83] : memref<3x5x32x256xbf16, #tpu.memory_space<vmem>>, vector<1x1x32x256xbf16>
    %68 = vector.shape_cast %67 : vector<1x1x32x256xbf16> to vector<32x256xbf16>
    %cst_84 = arith.constant dense<0.000000e+00> : vector<28x256xf32>
    %69 = tpu.matmul %66, %68, %cst_84 {dimension_numbers = #tpu.dot_dimension_numbers<[1], [0], [0], [1], [0, 0, 1, 1], [], []>} : vector<28x32xbf16>, vector<32x256xbf16>, vector<28x256xf32> -> vector<28x256xf32>
    %70 = arith.addf %63, %69 : vector<28x256xf32>
    %c0_85 = arith.constant 0 : index
    %c2_86 = arith.constant 2 : index
    %c0_87 = arith.constant 0 : index
    %c0_88 = arith.constant 0 : index
    %71 = vector.load %arg1[%c0_85, %c2_86, %c0_87, %c0_88] : memref<1x3x32x32xf32, #tpu.memory_space<vmem>>, vector<1x1x28x32xf32>
    %72 = vector.shape_cast %71 : vector<1x1x28x32xf32> to vector<28x32xf32>
    %73 = arith.truncf %72 : vector<28x32xf32> to vector<28x32xbf16>
    %c2_89 = arith.constant 2 : index
    %c0_90 = arith.constant 0 : index
    %c0_91 = arith.constant 0 : index
    %c0_92 = arith.constant 0 : index
    %74 = vector.load %arg2[%c2_89, %c0_90, %c0_91, %c0_92] : memref<3x5x32x256xbf16, #tpu.memory_space<vmem>>, vector<1x1x32x256xbf16>
    %75 = vector.shape_cast %74 : vector<1x1x32x256xbf16> to vector<32x256xbf16>
    %cst_93 = arith.constant dense<0.000000e+00> : vector<28x256xf32>
    %76 = tpu.matmul %73, %75, %cst_93 {dimension_numbers = #tpu.dot_dimension_numbers<[1], [0], [0], [1], [0, 0, 1, 1], [], []>} : vector<28x32xbf16>, vector<32x256xbf16>, vector<28x256xf32> -> vector<28x256xf32>
    %77 = arith.addf %70, %76 : vector<28x256xf32>
    %c0_94 = arith.constant 0 : index
    %c2_95 = arith.constant 2 : index
    %c1_96 = arith.constant 1 : index
    %c0_97 = arith.constant 0 : index
    %78 = vector.load %arg1[%c0_94, %c2_95, %c1_96, %c0_97] : memref<1x3x32x32xf32, #tpu.memory_space<vmem>>, vector<1x1x28x32xf32>
    %79 = vector.shape_cast %78 : vector<1x1x28x32xf32> to vector<28x32xf32>
    %80 = arith.truncf %79 : vector<28x32xf32> to vector<28x32xbf16>
    %c2_98 = arith.constant 2 : index
    %c1_99 = arith.constant 1 : index
    %c0_100 = arith.constant 0 : index
    %c0_101 = arith.constant 0 : index
    %81 = vector.load %arg2[%c2_98, %c1_99, %c0_100, %c0_101] : memref<3x5x32x256xbf16, #tpu.memory_space<vmem>>, vector<1x1x32x256xbf16>
    %82 = vector.shape_cast %81 : vector<1x1x32x256xbf16> to vector<32x256xbf16>
    %cst_102 = arith.constant dense<0.000000e+00> : vector<28x256xf32>
    %83 = tpu.matmul %80, %82, %cst_102 {dimension_numbers = #tpu.dot_dimension_numbers<[1], [0], [0], [1], [0, 0, 1, 1], [], []>} : vector<28x32xbf16>, vector<32x256xbf16>, vector<28x256xf32> -> vector<28x256xf32>
    %84 = arith.addf %77, %83 : vector<28x256xf32>
    %c0_103 = arith.constant 0 : index
    %c2_104 = arith.constant 2 : index
    %c2_105 = arith.constant 2 : index
    %c0_106 = arith.constant 0 : index
    %85 = vector.load %arg1[%c0_103, %c2_104, %c2_105, %c0_106] : memref<1x3x32x32xf32, #tpu.memory_space<vmem>>, vector<1x1x28x32xf32>
    %86 = vector.shape_cast %85 : vector<1x1x28x32xf32> to vector<28x32xf32>
    %87 = arith.truncf %86 : vector<28x32xf32> to vector<28x32xbf16>
    %c2_107 = arith.constant 2 : index
    %c2_108 = arith.constant 2 : index
    %c0_109 = arith.constant 0 : index
    %c0_110 = arith.constant 0 : index
    %88 = vector.load %arg2[%c2_107, %c2_108, %c0_109, %c0_110] : memref<3x5x32x256xbf16, #tpu.memory_space<vmem>>, vector<1x1x32x256xbf16>
    %89 = vector.shape_cast %88 : vector<1x1x32x256xbf16> to vector<32x256xbf16>
    %cst_111 = arith.constant dense<0.000000e+00> : vector<28x256xf32>
    %90 = tpu.matmul %87, %89, %cst_111 {dimension_numbers = #tpu.dot_dimension_numbers<[1], [0], [0], [1], [0, 0, 1, 1], [], []>} : vector<28x32xbf16>, vector<32x256xbf16>, vector<28x256xf32> -> vector<28x256xf32>
    %91 = arith.addf %84, %90 : vector<28x256xf32>
    %c0_112 = arith.constant 0 : index
    %c2_113 = arith.constant 2 : index
    %c3_114 = arith.constant 3 : index
    %c0_115 = arith.constant 0 : index
    %92 = vector.load %arg1[%c0_112, %c2_113, %c3_114, %c0_115] : memref<1x3x32x32xf32, #tpu.memory_space<vmem>>, vector<1x1x28x32xf32>
    %93 = vector.shape_cast %92 : vector<1x1x28x32xf32> to vector<28x32xf32>
    %94 = arith.truncf %93 : vector<28x32xf32> to vector<28x32xbf16>
    %c2_116 = arith.constant 2 : index
    %c3_117 = arith.constant 3 : index
    %c0_118 = arith.constant 0 : index
    %c0_119 = arith.constant 0 : index
    %95 = vector.load %arg2[%c2_116, %c3_117, %c0_118, %c0_119] : memref<3x5x32x256xbf16, #tpu.memory_space<vmem>>, vector<1x1x32x256xbf16>
    %96 = vector.shape_cast %95 : vector<1x1x32x256xbf16> to vector<32x256xbf16>
    %cst_120 = arith.constant dense<0.000000e+00> : vector<28x256xf32>
    %97 = tpu.matmul %94, %96, %cst_120 {dimension_numbers = #tpu.dot_dimension_numbers<[1], [0], [0], [1], [0, 0, 1, 1], [], []>} : vector<28x32xbf16>, vector<32x256xbf16>, vector<28x256xf32> -> vector<28x256xf32>
    %98 = arith.addf %91, %97 : vector<28x256xf32>
    %c0_121 = arith.constant 0 : index
    %c2_122 = arith.constant 2 : index
    %c4_123 = arith.constant 4 : index
    %c0_124 = arith.constant 0 : index
    %99 = vector.load %arg1[%c0_121, %c2_122, %c4_123, %c0_124] : memref<1x3x32x32xf32, #tpu.memory_space<vmem>>, vector<1x1x28x32xf32>
    %100 = vector.shape_cast %99 : vector<1x1x28x32xf32> to vector<28x32xf32>
    %101 = arith.truncf %100 : vector<28x32xf32> to vector<28x32xbf16>
    %c2_125 = arith.constant 2 : index
    %c4_126 = arith.constant 4 : index
    %c0_127 = arith.constant 0 : index
    %c0_128 = arith.constant 0 : index
    %102 = vector.load %arg2[%c2_125, %c4_126, %c0_127, %c0_128] : memref<3x5x32x256xbf16, #tpu.memory_space<vmem>>, vector<1x1x32x256xbf16>
    %103 = vector.shape_cast %102 : vector<1x1x32x256xbf16> to vector<32x256xbf16>
    %cst_129 = arith.constant dense<0.000000e+00> : vector<28x256xf32>
    %104 = tpu.matmul %101, %103, %cst_129 {dimension_numbers = #tpu.dot_dimension_numbers<[1], [0], [0], [1], [0, 0, 1, 1], [], []>} : vector<28x32xbf16>, vector<32x256xbf16>, vector<28x256xf32> -> vector<28x256xf32>
    %105 = arith.addf %98, %104 : vector<28x256xf32>
    %c0_130 = arith.constant 0 : index
    %c0_131 = arith.constant 0 : index
    %106 = vector.load %arg3[%c0_130, %c0_131] : memref<1x256xf32, #tpu.memory_space<vmem>>, vector<1x256xf32>
    %107 = vector.broadcast %106 : vector<1x256xf32> to vector<28x256xf32>
    %108 = arith.addf %105, %107 : vector<28x256xf32>
    %cst_132 = arith.constant 0.000000e+00 : f32
    %109 = vector.broadcast %cst_132 : f32 to vector<28x256xf32>
    %110 = arith.maximumf %108, %109 : vector<28x256xf32>
    %111 = vector.extract_strided_slice %110 {offsets = [0, 0], sizes = [28, 128], strides = [1, 1]} : vector<28x256xf32> to vector<28x128xf32>
    %112 = vector.extract_strided_slice %110 {offsets = [0, 128], sizes = [28, 128], strides = [1, 1]} : vector<28x256xf32> to vector<28x128xf32>
    %113 = arith.maximumf %111, %112 : vector<28x128xf32>
    %114 = tpu.iota {dimensions = array<i32: 0>} : vector<14x28xi32>
    %115 = tpu.iota {dimensions = array<i32: 1>} : vector<14x28xi32>
    %c2_i32 = arith.constant 2 : i32
    %116 = vector.broadcast %c2_i32 : i32 to vector<14x28xi32>
    %117 = arith.muli %116, %114 : vector<14x28xi32>
    %118 = arith.cmpi eq, %115, %117 : vector<14x28xi32>
    %cst_133 = arith.constant 1.000000e+00 : f32
    %cst_134 = arith.constant 0.000000e+00 : f32
    %119 = vector.broadcast %cst_133 : f32 to vector<14x28xf32>
    %120 = vector.broadcast %cst_134 : f32 to vector<14x28xf32>
    %121 = arith.select %118, %119, %120 : vector<14x28xi1>, vector<14x28xf32>
    %cst_135 = arith.constant dense<0.000000e+00> : vector<14x128xf32>
    %122 = tpu.matmul %121, %113, %cst_135 {dimension_numbers = #tpu.dot_dimension_numbers<[1], [0], [0], [1], [0, 0, 1, 1], [], []>} : vector<14x28xf32>, vector<28x128xf32>, vector<14x128xf32> -> vector<14x128xf32>
    %c2_i32_136 = arith.constant 2 : i32
    %123 = vector.broadcast %c2_i32_136 : i32 to vector<14x28xi32>
    %124 = arith.muli %123, %114 : vector<14x28xi32>
    %c1_i32 = arith.constant 1 : i32
    %125 = vector.broadcast %c1_i32 : i32 to vector<14x28xi32>
    %126 = arith.addi %124, %125 : vector<14x28xi32>
    %127 = arith.cmpi eq, %115, %126 : vector<14x28xi32>
    %cst_137 = arith.constant 1.000000e+00 : f32
    %cst_138 = arith.constant 0.000000e+00 : f32
    %128 = vector.broadcast %cst_137 : f32 to vector<14x28xf32>
    %129 = vector.broadcast %cst_138 : f32 to vector<14x28xf32>
    %130 = arith.select %127, %128, %129 : vector<14x28xi1>, vector<14x28xf32>
    %cst_139 = arith.constant dense<0.000000e+00> : vector<14x128xf32>
    %131 = tpu.matmul %130, %113, %cst_139 {dimension_numbers = #tpu.dot_dimension_numbers<[1], [0], [0], [1], [0, 0, 1, 1], [], []>} : vector<14x28xf32>, vector<28x128xf32>, vector<14x128xf32> -> vector<14x128xf32>
    %132 = arith.maximumf %122, %131 : vector<14x128xf32>
    %c0_140 = arith.constant 0 : index
    %c0_141 = arith.constant 0 : index
    %133 = vector.load %arg13[%c0_140, %c0_141] : memref<14x128xf32, #tpu.memory_space<vmem>>, vector<14x128xf32>
    tpu.vector_store %arg13[%c0_140, %c0_141], %132 {strides = array<i32>} : memref<14x128xf32, #tpu.memory_space<vmem>>, vector<14x128xf32>,
    %cst_142 = arith.constant 0.000000e+00 : f32
    %134 = vector.broadcast %cst_142 : f32 to vector<10x256xf32>
    %c0_143 = arith.constant 0 : index
    %c0_144 = arith.constant 0 : index
    %135 = vector.load %arg13[%c0_143, %c0_144] : memref<14x128xf32, #tpu.memory_space<vmem>>, vector<10x128xf32>
    %136 = arith.truncf %135 : vector<10x128xf32> to vector<10x128xbf16>
    %c0_145 = arith.constant 0 : index
    %c0_146 = arith.constant 0 : index
    %c0_147 = arith.constant 0 : index
    %137 = vector.load %arg4[%c0_145, %c0_146, %c0_147] : memref<5x128x256xbf16, #tpu.memory_space<vmem>>, vector<1x128x256xbf16>
    %138 = vector.shape_cast %137 : vector<1x128x256xbf16> to vector<128x256xbf16>
    %cst_148 = arith.constant dense<0.000000e+00> : vector<10x256xf32>
    %139 = tpu.matmul %136, %138, %cst_148 {dimension_numbers = #tpu.dot_dimension_numbers<[1], [0], [0], [1], [0, 0, 1, 1], [], []>} : vector<10x128xbf16>, vector<128x256xbf16>, vector<10x256xf32> -> vector<10x256xf32>
    %140 = arith.addf %134, %139 : vector<10x256xf32>
    %c1_149 = arith.constant 1 : index
    %c0_150 = arith.constant 0 : index
    %141 = vector.load %arg13[%c1_149, %c0_150] : memref<14x128xf32, #tpu.memory_space<vmem>>, vector<10x128xf32>
    %142 = arith.truncf %141 : vector<10x128xf32> to vector<10x128xbf16>
    %c1_151 = arith.constant 1 : index
    %c0_152 = arith.constant 0 : index
    %c0_153 = arith.constant 0 : index
    %143 = vector.load %arg4[%c1_151, %c0_152, %c0_153] : memref<5x128x256xbf16, #tpu.memory_space<vmem>>, vector<1x128x256xbf16>
    %144 = vector.shape_cast %143 : vector<1x128x256xbf16> to vector<128x256xbf16>
    %cst_154 = arith.constant dense<0.000000e+00> : vector<10x256xf32>
    %145 = tpu.matmul %142, %144, %cst_154 {dimension_numbers = #tpu.dot_dimension_numbers<[1], [0], [0], [1], [0, 0, 1, 1], [], []>} : vector<10x128xbf16>, vector<128x256xbf16>, vector<10x256xf32> -> vector<10x256xf32>
    %146 = arith.addf %140, %145 : vector<10x256xf32>
    %c2_155 = arith.constant 2 : index
    %c0_156 = arith.constant 0 : index
    %147 = vector.load %arg13[%c2_155, %c0_156] : memref<14x128xf32, #tpu.memory_space<vmem>>, vector<10x128xf32>
    %148 = arith.truncf %147 : vector<10x128xf32> to vector<10x128xbf16>
    %c2_157 = arith.constant 2 : index
    %c0_158 = arith.constant 0 : index
    %c0_159 = arith.constant 0 : index
    %149 = vector.load %arg4[%c2_157, %c0_158, %c0_159] : memref<5x128x256xbf16, #tpu.memory_space<vmem>>, vector<1x128x256xbf16>
    %150 = vector.shape_cast %149 : vector<1x128x256xbf16> to vector<128x256xbf16>
    %cst_160 = arith.constant dense<0.000000e+00> : vector<10x256xf32>
    %151 = tpu.matmul %148, %150, %cst_160 {dimension_numbers = #tpu.dot_dimension_numbers<[1], [0], [0], [1], [0, 0, 1, 1], [], []>} : vector<10x128xbf16>, vector<128x256xbf16>, vector<10x256xf32> -> vector<10x256xf32>
    %152 = arith.addf %146, %151 : vector<10x256xf32>
    %c3_161 = arith.constant 3 : index
    %c0_162 = arith.constant 0 : index
    %153 = vector.load %arg13[%c3_161, %c0_162] : memref<14x128xf32, #tpu.memory_space<vmem>>, vector<10x128xf32>
    %154 = arith.truncf %153 : vector<10x128xf32> to vector<10x128xbf16>
    %c3_163 = arith.constant 3 : index
    %c0_164 = arith.constant 0 : index
    %c0_165 = arith.constant 0 : index
    %155 = vector.load %arg4[%c3_163, %c0_164, %c0_165] : memref<5x128x256xbf16, #tpu.memory_space<vmem>>, vector<1x128x256xbf16>
    %156 = vector.shape_cast %155 : vector<1x128x256xbf16> to vector<128x256xbf16>
    %cst_166 = arith.constant dense<0.000000e+00> : vector<10x256xf32>
    %157 = tpu.matmul %154, %156, %cst_166 {dimension_numbers = #tpu.dot_dimension_numbers<[1], [0], [0], [1], [0, 0, 1, 1], [], []>} : vector<10x128xbf16>, vector<128x256xbf16>, vector<10x256xf32> -> vector<10x256xf32>
    %158 = arith.addf %152, %157 : vector<10x256xf32>
    %c4_167 = arith.constant 4 : index
    %c0_168 = arith.constant 0 : index
    %159 = vector.load %arg13[%c4_167, %c0_168] : memref<14x128xf32, #tpu.memory_space<vmem>>, vector<10x128xf32>
    %160 = arith.truncf %159 : vector<10x128xf32> to vector<10x128xbf16>
    %c4_169 = arith.constant 4 : index
    %c0_170 = arith.constant 0 : index
    %c0_171 = arith.constant 0 : index
    %161 = vector.load %arg4[%c4_169, %c0_170, %c0_171] : memref<5x128x256xbf16, #tpu.memory_space<vmem>>, vector<1x128x256xbf16>
    %162 = vector.shape_cast %161 : vector<1x128x256xbf16> to vector<128x256xbf16>
    %cst_172 = arith.constant dense<0.000000e+00> : vector<10x256xf32>
    %163 = tpu.matmul %160, %162, %cst_172 {dimension_numbers = #tpu.dot_dimension_numbers<[1], [0], [0], [1], [0, 0, 1, 1], [], []>} : vector<10x128xbf16>, vector<128x256xbf16>, vector<10x256xf32> -> vector<10x256xf32>
    %164 = arith.addf %158, %163 : vector<10x256xf32>
    %c0_173 = arith.constant 0 : index
    %c0_174 = arith.constant 0 : index
    %165 = vector.load %arg5[%c0_173, %c0_174] : memref<1x256xf32, #tpu.memory_space<vmem>>, vector<1x256xf32>
    %166 = vector.broadcast %165 : vector<1x256xf32> to vector<10x256xf32>
    %167 = arith.addf %164, %166 : vector<10x256xf32>
    %cst_175 = arith.constant 0.000000e+00 : f32
    %168 = vector.broadcast %cst_175 : f32 to vector<10x256xf32>
    %169 = arith.maximumf %167, %168 : vector<10x256xf32>
    %170 = vector.extract_strided_slice %169 {offsets = [0, 0], sizes = [10, 128], strides = [1, 1]} : vector<10x256xf32> to vector<10x128xf32>
    %171 = vector.extract_strided_slice %169 {offsets = [0, 128], sizes = [10, 128], strides = [1, 1]} : vector<10x256xf32> to vector<10x128xf32>
    %172 = arith.maximumf %170, %171 : vector<10x128xf32>
    %173 = tpu.iota {dimensions = array<i32: 0>} : vector<5x10xi32>
    %174 = tpu.iota {dimensions = array<i32: 1>} : vector<5x10xi32>
    %c2_i32_176 = arith.constant 2 : i32
    %175 = vector.broadcast %c2_i32_176 : i32 to vector<5x10xi32>
    %176 = arith.muli %175, %173 : vector<5x10xi32>
    %177 = arith.cmpi eq, %174, %176 : vector<5x10xi32>
    %cst_177 = arith.constant 1.000000e+00 : f32
    %cst_178 = arith.constant 0.000000e+00 : f32
    %178 = vector.broadcast %cst_177 : f32 to vector<5x10xf32>
    %179 = vector.broadcast %cst_178 : f32 to vector<5x10xf32>
    %180 = arith.select %177, %178, %179 : vector<5x10xi1>, vector<5x10xf32>
    %cst_179 = arith.constant dense<0.000000e+00> : vector<5x128xf32>
    %181 = tpu.matmul %180, %172, %cst_179 {dimension_numbers = #tpu.dot_dimension_numbers<[1], [0], [0], [1], [0, 0, 1, 1], [], []>} : vector<5x10xf32>, vector<10x128xf32>, vector<5x128xf32> -> vector<5x128xf32>
    %c2_i32_180 = arith.constant 2 : i32
    %182 = vector.broadcast %c2_i32_180 : i32 to vector<5x10xi32>
    %183 = arith.muli %182, %173 : vector<5x10xi32>
    %c1_i32_181 = arith.constant 1 : i32
    %184 = vector.broadcast %c1_i32_181 : i32 to vector<5x10xi32>
    %185 = arith.addi %183, %184 : vector<5x10xi32>
    %186 = arith.cmpi eq, %174, %185 : vector<5x10xi32>
    %cst_182 = arith.constant 1.000000e+00 : f32
    %cst_183 = arith.constant 0.000000e+00 : f32
    %187 = vector.broadcast %cst_182 : f32 to vector<5x10xf32>
    %188 = vector.broadcast %cst_183 : f32 to vector<5x10xf32>
    %189 = arith.select %186, %187, %188 : vector<5x10xi1>, vector<5x10xf32>
    %cst_184 = arith.constant dense<0.000000e+00> : vector<5x128xf32>
    %190 = tpu.matmul %189, %172, %cst_184 {dimension_numbers = #tpu.dot_dimension_numbers<[1], [0], [0], [1], [0, 0, 1, 1], [], []>} : vector<5x10xf32>, vector<10x128xf32>, vector<5x128xf32> -> vector<5x128xf32>
    %191 = arith.maximumf %181, %190 : vector<5x128xf32>
    %c0_185 = arith.constant 0 : index
    %c0_186 = arith.constant 0 : index
    %192 = vector.load %arg14[%c0_185, %c0_186] : memref<5x128xf32, #tpu.memory_space<vmem>>, vector<5x128xf32>
    tpu.vector_store %arg14[%c0_185, %c0_186], %191 {strides = array<i32>} : memref<5x128xf32, #tpu.memory_space<vmem>>, vector<5x128xf32>,
    %cst_187 = arith.constant 0.000000e+00 : f32
    %193 = vector.broadcast %cst_187 : f32 to vector<1x120xf32>
    %c0_188 = arith.constant 0 : index
    %c0_189 = arith.constant 0 : index
    %194 = vector.load %arg14[%c0_188, %c0_189] : memref<5x128xf32, #tpu.memory_space<vmem>>, vector<1x128xf32>
    %195 = arith.truncf %194 : vector<1x128xf32> to vector<1x128xbf16>
    %c0_190 = arith.constant 0 : index
    %c0_191 = arith.constant 0 : index
    %c0_192 = arith.constant 0 : index
    %196 = vector.load %arg6[%c0_190, %c0_191, %c0_192] : memref<5x128x120xbf16, #tpu.memory_space<vmem>>, vector<1x128x120xbf16>
    %197 = vector.shape_cast %196 : vector<1x128x120xbf16> to vector<128x120xbf16>
    %cst_193 = arith.constant dense<0.000000e+00> : vector<1x120xf32>
    %198 = tpu.matmul %195, %197, %cst_193 {dimension_numbers = #tpu.dot_dimension_numbers<[1], [0], [0], [1], [0, 0, 1, 1], [], []>} : vector<1x128xbf16>, vector<128x120xbf16>, vector<1x120xf32> -> vector<1x120xf32>
    %199 = arith.addf %193, %198 : vector<1x120xf32>
    %c1_194 = arith.constant 1 : index
    %c0_195 = arith.constant 0 : index
    %200 = vector.load %arg14[%c1_194, %c0_195] : memref<5x128xf32, #tpu.memory_space<vmem>>, vector<1x128xf32>
    %201 = arith.truncf %200 : vector<1x128xf32> to vector<1x128xbf16>
    %c1_196 = arith.constant 1 : index
    %c0_197 = arith.constant 0 : index
    %c0_198 = arith.constant 0 : index
    %202 = vector.load %arg6[%c1_196, %c0_197, %c0_198] : memref<5x128x120xbf16, #tpu.memory_space<vmem>>, vector<1x128x120xbf16>
    %203 = vector.shape_cast %202 : vector<1x128x120xbf16> to vector<128x120xbf16>
    %cst_199 = arith.constant dense<0.000000e+00> : vector<1x120xf32>
    %204 = tpu.matmul %201, %203, %cst_199 {dimension_numbers = #tpu.dot_dimension_numbers<[1], [0], [0], [1], [0, 0, 1, 1], [], []>} : vector<1x128xbf16>, vector<128x120xbf16>, vector<1x120xf32> -> vector<1x120xf32>
    %205 = arith.addf %199, %204 : vector<1x120xf32>
    %c2_200 = arith.constant 2 : index
    %c0_201 = arith.constant 0 : index
    %206 = vector.load %arg14[%c2_200, %c0_201] : memref<5x128xf32, #tpu.memory_space<vmem>>, vector<1x128xf32>
    %207 = arith.truncf %206 : vector<1x128xf32> to vector<1x128xbf16>
    %c2_202 = arith.constant 2 : index
    %c0_203 = arith.constant 0 : index
    %c0_204 = arith.constant 0 : index
    %208 = vector.load %arg6[%c2_202, %c0_203, %c0_204] : memref<5x128x120xbf16, #tpu.memory_space<vmem>>, vector<1x128x120xbf16>
    %209 = vector.shape_cast %208 : vector<1x128x120xbf16> to vector<128x120xbf16>
    %cst_205 = arith.constant dense<0.000000e+00> : vector<1x120xf32>
    %210 = tpu.matmul %207, %209, %cst_205 {dimension_numbers = #tpu.dot_dimension_numbers<[1], [0], [0], [1], [0, 0, 1, 1], [], []>} : vector<1x128xbf16>, vector<128x120xbf16>, vector<1x120xf32> -> vector<1x120xf32>
    %211 = arith.addf %205, %210 : vector<1x120xf32>
    %c3_206 = arith.constant 3 : index
    %c0_207 = arith.constant 0 : index
    %212 = vector.load %arg14[%c3_206, %c0_207] : memref<5x128xf32, #tpu.memory_space<vmem>>, vector<1x128xf32>
    %213 = arith.truncf %212 : vector<1x128xf32> to vector<1x128xbf16>
    %c3_208 = arith.constant 3 : index
    %c0_209 = arith.constant 0 : index
    %c0_210 = arith.constant 0 : index
    %214 = vector.load %arg6[%c3_208, %c0_209, %c0_210] : memref<5x128x120xbf16, #tpu.memory_space<vmem>>, vector<1x128x120xbf16>
    %215 = vector.shape_cast %214 : vector<1x128x120xbf16> to vector<128x120xbf16>
    %cst_211 = arith.constant dense<0.000000e+00> : vector<1x120xf32>
    %216 = tpu.matmul %213, %215, %cst_211 {dimension_numbers = #tpu.dot_dimension_numbers<[1], [0], [0], [1], [0, 0, 1, 1], [], []>} : vector<1x128xbf16>, vector<128x120xbf16>, vector<1x120xf32> -> vector<1x120xf32>
    %217 = arith.addf %211, %216 : vector<1x120xf32>
    %c4_212 = arith.constant 4 : index
    %c0_213 = arith.constant 0 : index
    %218 = vector.load %arg14[%c4_212, %c0_213] : memref<5x128xf32, #tpu.memory_space<vmem>>, vector<1x128xf32>
    %219 = arith.truncf %218 : vector<1x128xf32> to vector<1x128xbf16>
    %c4_214 = arith.constant 4 : index
    %c0_215 = arith.constant 0 : index
    %c0_216 = arith.constant 0 : index
    %220 = vector.load %arg6[%c4_214, %c0_215, %c0_216] : memref<5x128x120xbf16, #tpu.memory_space<vmem>>, vector<1x128x120xbf16>
    %221 = vector.shape_cast %220 : vector<1x128x120xbf16> to vector<128x120xbf16>
    %cst_217 = arith.constant dense<0.000000e+00> : vector<1x120xf32>
    %222 = tpu.matmul %219, %221, %cst_217 {dimension_numbers = #tpu.dot_dimension_numbers<[1], [0], [0], [1], [0, 0, 1, 1], [], []>} : vector<1x128xbf16>, vector<128x120xbf16>, vector<1x120xf32> -> vector<1x120xf32>
    %223 = arith.addf %217, %222 : vector<1x120xf32>
    %c0_218 = arith.constant 0 : index
    %c0_219 = arith.constant 0 : index
    %224 = vector.load %arg7[%c0_218, %c0_219] : memref<1x120xf32, #tpu.memory_space<vmem>>, vector<1x120xf32>
    %225 = arith.addf %223, %224 : vector<1x120xf32>
    %cst_220 = arith.constant 0.000000e+00 : f32
    %226 = vector.broadcast %cst_220 : f32 to vector<1x120xf32>
    %227 = arith.maximumf %225, %226 : vector<1x120xf32>
    %228 = arith.truncf %227 : vector<1x120xf32> to vector<1x120xbf16>
    %c0_221 = arith.constant 0 : index
    %c0_222 = arith.constant 0 : index
    %229 = vector.load %arg8[%c0_221, %c0_222] : memref<120x84xbf16, #tpu.memory_space<vmem>>, vector<120x84xbf16>
    %cst_223 = arith.constant dense<0.000000e+00> : vector<1x84xf32>
    %230 = tpu.matmul %228, %229, %cst_223 {dimension_numbers = #tpu.dot_dimension_numbers<[1], [0], [0], [1], [0, 0, 1, 1], [], []>} : vector<1x120xbf16>, vector<120x84xbf16>, vector<1x84xf32> -> vector<1x84xf32>
    %c0_224 = arith.constant 0 : index
    %c0_225 = arith.constant 0 : index
    %231 = vector.load %arg9[%c0_224, %c0_225] : memref<1x84xf32, #tpu.memory_space<vmem>>, vector<1x84xf32>
    %232 = arith.addf %230, %231 : vector<1x84xf32>
    %cst_226 = arith.constant 0.000000e+00 : f32
    %233 = vector.broadcast %cst_226 : f32 to vector<1x84xf32>
    %234 = arith.maximumf %232, %233 : vector<1x84xf32>
    %235 = arith.truncf %234 : vector<1x84xf32> to vector<1x84xbf16>
    %c0_227 = arith.constant 0 : index
    %c0_228 = arith.constant 0 : index
    %236 = vector.load %arg10[%c0_227, %c0_228] : memref<84x10xbf16, #tpu.memory_space<vmem>>, vector<84x10xbf16>
    %cst_229 = arith.constant dense<0.000000e+00> : vector<1x10xf32>
    %237 = tpu.matmul %235, %236, %cst_229 {dimension_numbers = #tpu.dot_dimension_numbers<[1], [0], [0], [1], [0, 0, 1, 1], [], []>} : vector<1x84xbf16>, vector<84x10xbf16>, vector<1x10xf32> -> vector<1x10xf32>
    %c0_230 = arith.constant 0 : index
    %c0_231 = arith.constant 0 : index
    %238 = vector.load %arg11[%c0_230, %c0_231] : memref<1x10xf32, #tpu.memory_space<vmem>>, vector<1x10xf32>
    %239 = arith.addf %237, %238 : vector<1x10xf32>
    %c0_232 = arith.constant 0 : index
    %c0_233 = arith.constant 0 : index
    %c0_234 = arith.constant 0 : index
    %240 = vector.load %arg12[%c0_232, %c0_233, %c0_234] : memref<1x1x10xf32, #tpu.memory_space<vmem>>, vector<1x1x10xf32>
    %241 = vector.shape_cast %240 : vector<1x1x10xf32> to vector<1x10xf32>
    %242 = vector.shape_cast %239 : vector<1x10xf32> to vector<1x1x10xf32>
    tpu.vector_store %arg12[%c0_232, %c0_233, %c0_234], %242 {strides = array<i32>} : memref<1x1x10xf32, #tpu.memory_space<vmem>>, vector<1x1x10xf32>,
    return
  }
  func.func @transform_0(%arg0: i32) -> (i32, i32, i32, i32) {
    %c0_i32 = arith.constant 0 : i32
    %c0_i32_0 = arith.constant 0 : i32
    %c0_i32_1 = arith.constant 0 : i32
    %c0_i32_2 = arith.constant 0 : i32
    return %arg0, %c0_i32, %c0_i32_0, %c0_i32_1 : i32, i32, i32, i32
  }
  func.func @transform_1(%arg0: i32) -> (i32, i32, i32, i32) {
    %c0_i32 = arith.constant 0 : i32
    %c0_i32_0 = arith.constant 0 : i32
    %c0_i32_1 = arith.constant 0 : i32
    %c0_i32_2 = arith.constant 0 : i32
    %c0_i32_3 = arith.constant 0 : i32
    return %c0_i32, %c0_i32_0, %c0_i32_1, %c0_i32_2 : i32, i32, i32, i32
  }
  func.func @transform_2(%arg0: i32) -> (i32, i32) {
    %c0_i32 = arith.constant 0 : i32
    %c0_i32_0 = arith.constant 0 : i32
    %c0_i32_1 = arith.constant 0 : i32
    return %c0_i32, %c0_i32_0 : i32, i32
  }
  func.func @transform_3(%arg0: i32) -> (i32, i32, i32) {
    %c0_i32 = arith.constant 0 : i32
    %c0_i32_0 = arith.constant 0 : i32
    %c0_i32_1 = arith.constant 0 : i32
    %c0_i32_2 = arith.constant 0 : i32
    return %c0_i32, %c0_i32_0, %c0_i32_1 : i32, i32, i32
  }
  func.func @transform_4(%arg0: i32) -> (i32, i32) {
    %c0_i32 = arith.constant 0 : i32
    %c0_i32_0 = arith.constant 0 : i32
    %c0_i32_1 = arith.constant 0 : i32
    return %c0_i32, %c0_i32_0 : i32, i32
  }
  func.func @transform_5(%arg0: i32) -> (i32, i32, i32) {
    %c0_i32 = arith.constant 0 : i32
    %c0_i32_0 = arith.constant 0 : i32
    %c0_i32_1 = arith.constant 0 : i32
    %c0_i32_2 = arith.constant 0 : i32
    return %c0_i32, %c0_i32_0, %c0_i32_1 : i32, i32, i32
  }
  func.func @transform_6(%arg0: i32) -> (i32, i32) {
    %c0_i32 = arith.constant 0 : i32
    %c0_i32_0 = arith.constant 0 : i32
    %c0_i32_1 = arith.constant 0 : i32
    return %c0_i32, %c0_i32_0 : i32, i32
  }
  func.func @transform_7(%arg0: i32) -> (i32, i32) {
    %c0_i32 = arith.constant 0 : i32
    %c0_i32_0 = arith.constant 0 : i32
    %c0_i32_1 = arith.constant 0 : i32
    return %c0_i32, %c0_i32_0 : i32, i32
  }
  func.func @transform_8(%arg0: i32) -> (i32, i32) {
    %c0_i32 = arith.constant 0 : i32
    %c0_i32_0 = arith.constant 0 : i32
    %c0_i32_1 = arith.constant 0 : i32
    return %c0_i32, %c0_i32_0 : i32, i32
  }
  func.func @transform_9(%arg0: i32) -> (i32, i32) {
    %c0_i32 = arith.constant 0 : i32
    %c0_i32_0 = arith.constant 0 : i32
    %c0_i32_1 = arith.constant 0 : i32
    return %c0_i32, %c0_i32_0 : i32, i32
  }
  func.func @transform_10(%arg0: i32) -> (i32, i32) {
    %c0_i32 = arith.constant 0 : i32
    %c0_i32_0 = arith.constant 0 : i32
    %c0_i32_1 = arith.constant 0 : i32
    return %c0_i32, %c0_i32_0 : i32, i32
  }
  func.func @transform_11(%arg0: i32) -> (i32, i32, i32) {
    %c0_i32 = arith.constant 0 : i32
    %c0_i32_0 = arith.constant 0 : i32
    %c0_i32_1 = arith.constant 0 : i32
    return %arg0, %c0_i32, %c0_i32_0 : i32, i32, i32
  }
}

</mosaic_0001>

<bundles_post_ra>
// kernel: simple_convnet_forward.1
= control target key start
LH: loop header
LB: loop body
LE: loop exit
PB: predicated region body
PF: predicated region fallthrough
CT: control target
= control target key end

     0   :  { %s5997_s0 = inlined_call_operand.hbm [shape: f32[2,3,32,32], index: 0, kind: input, shape index: {}]   ;;  %s5998_s1 = inlined_call_operand.hbm [shape: bf16[3,5,32,256], index: 1, kind: input, shape index: {}]   ;;  %s5999_s2 = inlined_call_operand.vmem [shape: f32[1,256], index: 2, kind: input, shape index: {}]   ;;  %s6000_s3 = inlined_call_operand.vmem [shape: bf16[5,128,256], index: 3, kind: input, shape index: {}]   ;;  %s6001_s4 = inlined_call_operand.vmem [shape: f32[1,256], index: 4, kind: input, shape index: {}]   ;;  %s6002_s5 = inlined_call_operand.vmem [shape: bf16[5,128,120], index: 5, kind: input, shape index: {}]   ;;  %s6003_s6 = inlined_call_operand.vmem [shape: f32[1,120], index: 6, kind: input, shape index: {}]   ;;  %s6004_s7 = inlined_call_operand.vmem [shape: bf16[120,84], index: 7, kind: input, shape index: {}]   ;;  %s6005_s8 = inlined_call_operand.vmem [shape: f32[1,84], index: 8, kind: input, shape index: {}]   ;;  %s6006_s9 = inlined_call_operand.vmem [shape: bf16[84,10], index: 9, kind: input, shape index: {}]   ;;  %s6007_s10 = inlined_call_operand.vmem [shape: f32[1,10], index: 10, kind: input, shape index: {}]   ;;  %s6008_s11 = inlined_call_operand.hbm [shape: f32[2,1,10], index: 11, kind: output, shape index: {}]  }
   0x1   :  { %6029 = sst [smem:[#allocation34_spill]] %s5998_s1 }
   0x2   :  { %16 = vsyncpa [#allocation5], 0 }
   0x3   :  { %18 = vsyncpa [#allocation5 + $0x1], 0 }
   0x4   :  { %19 = vsyncpa [#allocation8], 0 }
   0x5   :  { %20 = vsyncpa [#allocation6], 0 }
   0x6   :  { %22 = vsyncpa [#allocation6 + $0x1], 0  ;;  %s5019_s17 = smov 0   ;;  %s5021_s18 = smov 0  }
   0x7   :  { %s5023_s19 = smov 0   ;;  %s5025_s20 = smov 0  }
   0x8 LB: > { %6030 = sst [smem:[#allocation13_spill]] %s4937_s17  ;;  %s5040_s21 = sadd.s32 4294967295, %s4949_s20   ;;  %s4949_s20 = sphi %s5025_s20, %s6091_s20   ;;  %s4945_s19 = sphi %s5023_s19, %s6095_s19   ;;  %s4941_s18 = sphi %s5021_s18, %s6094_s18   ;;  %s4937_s17 = sphi %s5019_s17, %s6093_s17  }
   0x9   : > { %s3829_s22 = sadd.s32 4294967294, %s4949_s20   ;;  %p48_p0 = scmp.ne.s32.totalorder %s4941_s18, %s4937_s17 }
   0xa   : > { %p6015_p1 = scmp.eq.s32.totalorder %s5040_s21, 0  ;;  %p288_p3 = scmp.eq.s32.totalorder %s3829_s22, 1 }
   0xb   : > { %p3830_p5 = scmp.ge.s32.totalorder %s4949_s20, 1  ;;  %p295_p7 = scmp.lt.s32.totalorder %s4949_s20, 3 }
   0xc   : > { %p5049_p4 = por %p6015_p1, %p48_p0  ;;  %p5054_p6 = por %p288_p3, %p48_p0 }
   0xd   : > { %p5059_p8 = pnand %p3830_p5, %p295_p7  ;;  %s4951_s26 = smov [#allocation7]  }
   0xe   : > { %s6031_s23 = scalar_select %p5049_p4, 1, 0 }
   0xf   : > { %s6032_s24 = scalar_select %p5054_p6, 1, 0 }
  0x10   : > { %s6034_s25 = scalar_select %p5059_p8, 1, 0 }
  0x11   : > { %6033 = sst [smem:[#allocation14_spill]] %s6032_s24  ;;  %s307_s27 = sshll.u32 %s4951_s26, 4  ;;  %s308_s27 = int_to_ptr.vmem [resolvable:$true] %s307_s27 }
  0x12   : > { %p4509_p9 = pneg %p5059_p8  ;;  %s5073_s29 = sadd.s32 1, %s4949_s20  }
  0x13   : > { %6036 = sst [smem:[#allocation15_spill]] %s5073_s29  ;;  %s35_s30 = sadd.s32 1, %s4945_s19 }
  0x14   : > { %p5068_p11 = pnand %p4509_p9, %p6015_p1  ;;  %s32_s12 = ssub.s32 %s4949_s20, %s5073_s29 }
  0x15   : > { %s4838_s13 = scalar_lea.vmem %s308_s27, 7680  ;;  %p4846_p5 = scmp.lt.s32.totalorder %s308_s27, %s308_s27 }
  0x16   : > { %p4829_p12 = pneg %p5068_p11  ;;  %p4839_p13 = scmp.ne.s32.totalorder %s308_s27, %s4838_s13 }
  0x17   : > { %p4847_p7 = scmp.lt.s32.totalorder %s4838_s13, %s4838_s13 }
  0x18   : > { %p4841_p0 = pnand %p4839_p13, %p4829_p12 }
  0x19   : > { %p4848_p10 = por %p4847_p7, %p4846_p5 }
  0x1a   : > { %p4842_p3 = pneg %p4841_p0 }
  0x1c   : > { %p4849_p2 = pnand %p4848_p10, %p4842_p3 }
  0x1e   : > { %4852 = shalt.err (!%p4849_p2)
}
  0x1f   : > { %s6013_s14 = smov 128   ;;  %s6014_s15 = smov 8  }
  0x20   : > { %s6037_s1 = sld [smem:[#allocation34_spill]]  ;;  %p33_p2 = scmp.eq.s32.totalorder %s32_s12, 0 }
  0x21   : > { %p42_p9 = scmp.ne.s32.totalorder %s4945_s19, %s4941_s18  ;;  %p43_p10 = scmp.eq.s32.totalorder %s4949_s20, 0 }
  0x22   : > { %p4522_p12 = scmp.lt.s32.totalorder %s4949_s20, 2  ;;  %p6039_p0 = scmp.eq.s32.totalorder %s5040_s21, 1 }
  0x23   : > { %s5093_s26 = scalar_select %p33_p2, %s4945_s19, %s35_s30  }
  0x24   : > { %p44_p13 = por %p43_p10, %p42_p9  ;;  %p5097_p3 = por %p6039_p0, %p42_p9 }
  0x25   : > { %6038 = sst [smem:[#allocation16_spill]] %s5093_s26  ;;  %s348_s28 = sand.u32 1, %s4945_s19  }
  0x26   : > { %4512 = dma.hbm_to_vmem [thread:$0]  (!%p5068_p11), %s6037_s1, 7680, %s308_s27, [#allocation8], %s6013_s14, %s6013_s14, %s6014_s15  }
  0x27   : > { %s6040_s13 = scalar_select %p5097_p3, 1, 0 }
  0x28   : > { %s4499_s29 = smul.u32 1536, %s4949_s20  ;;  %p5103_p5 = pnand %p4522_p12, %p44_p13 }
  0x29   : > { %s4498_s24 = smul.u32 96, %s348_s28  ;;  %s5114_s14 = scalar_lea.sflag [#allocation5], %s348_s28 }
  0x2a   : > { %s5110_s16 = scalar_lea.hbm %s5997_s0, %s4499_s29  ;;  %p4855_p7 = pneg %p5103_p5 }
  0x2b   : > { %s352_s30 = scalar_lea.vmem [#allocation4], %s4498_s24  ;;  %s4853_s15 = scalar_lea.hbm %s5110_s16, 1536 }
  0x2c   : > { %s359_s22 = sshll.u32 %s352_s30, 4  ;;  %p4854_p11 = scmp.ne.s32.totalorder %s5110_s16, %s4853_s15  ;;  %s5112_s22 = int_to_ptr.vmem [resolvable:$true] %s359_s22 }
  0x2d   : > { %s4858_s29 = scalar_lea.hbm %s5997_s0, 3072  ;;  %p4859_p10 = scmp.lt.s32.totalorder %s5110_s16, %s5997_s0 }
  0x2e   : > { %p4856_p2 = pnand %p4855_p7, %p4854_p11  ;;  %p4860_p12 = scmp.lt.s32.totalorder %s4858_s29, %s4853_s15 }
  0x30   : > { %p4857_p9 = pneg %p4856_p2  ;;  %p4861_p13 = por %p4860_p12, %p4859_p10 }
  0x32   : > { %p4862_p0 = pnand %p4861_p13, %p4857_p9 }
  0x34   : > { %4865 = shalt.err (!%p4862_p0)
}
  0x35   : > { %s4866_s24 = scalar_lea.vmem %s5112_s22, 1536  ;;  %s4954_s28 = smov [#allocation4]  }
  0x36   : > { %p4867_p1 = scmp.ne.s32.totalorder %s5112_s22, %s4866_s24  ;;  %s4871_s30 = sshll.u32 %s4954_s28, 4  ;;  %s4872_s30 = int_to_ptr.vmem [resolvable:$false] %s4871_s30 }
  0x37   : > { %s4873_s1 = scalar_lea.vmem %s4872_s30, 3072  ;;  %p4874_p2 = scmp.lt.s32.totalorder %s5112_s22, %s4872_s30 }
  0x38   : > { %p4869_p6 = pnand %p4867_p1, %p4855_p7  ;;  %p4875_p3 = scmp.lt.s32.totalorder %s4873_s1, %s4866_s24 }
  0x3a   : > { %p4870_p11 = pneg %p4869_p6  ;;  %p4876_p4 = por %p4875_p3, %p4874_p2 }
  0x3c   : > { %p4877_p8 = pnand %p4876_p4, %p4870_p11 }
  0x3e   : > { %4880 = shalt.err (!%p4877_p8)
}
  0x3f   : > { %s6042_s15 = smov 8   ;;  %s6043_s26 = smov 128  }
  0x40   : > { %4516 = dma.hbm_to_vmem [thread:$0]  (!%p5103_p5), %s5110_s16, 1536, %s5112_s22, %s5114_s14, %s6043_s26, %s6043_s26, %s6042_s15  }
  0x41   : > { %p6044_p1 = scmp.ne.s32.totalorder %s6034_s25, 0 }
  0x43   : > { %371 = sbr.rel (%p6044_p1) target bundleno = 1804 (0x70c), region = 64 }
  0x48   : > { %s5141_s27 = sand.u32 1, %s4941_s18   ;;  %p6045_p4 = scmp.ne.s32.totalorder %s6031_s23, 0 }
  0x49   : > { %s4500_s29 = smul.u32 96, %s5141_s27  ;;  %s374_s12 = scalar_lea.sflag [#allocation5], %s5141_s27 }
  0x4b   : > { %s5145_s24 = scalar_lea.vmem [#allocation4], %s4500_s29 }
  0x4c   : > { %4924 = dma.done.wait (%p6045_p4), %s374_s12, 1536  }
  0x4d   : > { %4926 = vsyncadd (%p6045_p4), %s374_s12, 4294965760  ;;  %p6046_p6 = scmp.eq.s32.totalorder %s5040_s21, 0 }
  0x4f   : > { %4928 = dma.done.wait (%p6046_p6), [#allocation8], 7680   ;;  %p6047_p8 = pmov %p6046_p6 }
  0x50   : > { %v6019_v0 = vmov 0   ;;  %v4563_v1 = vld [vmem:[#allocation7 + $0x34] ss:$8 sps:$4 sm:$0xff]   ;;  %v4565_v2 = vld [vmem:[#allocation7 + $0x30] ss:$8 sps:$4 sm:$0xff]   ;;  %v430_v5 = vld [vmem:[%s5145_s24 + $0x1] sm:$0xff] }
  0x51   : > { %4930 = vsyncadd (%p6047_p8), [#allocation8], 4294959616  ;;  %500 = vmatprep.mubr.bf16.mxu0 %v6019_v0  ;;  %589 = vmatprep.mubr.bf16.mxu1 %v6019_v0  ;;  %v4566_v3 = vld [vmem:[#allocation7 + $0x24] ss:$8 sps:$4 sm:$0xff]   ;;  %v4568_v4 = vld [vmem:[#allocation7 + $0x20] ss:$8 sps:$4 sm:$0xff]  }
  0x52   : > { %480 = vmatprep.subr.bf16.mxu0 %v4563_v1  ;;  %v431_v6 = vld [vmem:[%s5145_s24 + $0x9] sm:$0xff]  ;;  %v4569_v7 = vld [vmem:[#allocation7 + $0x14] ss:$8 sps:$4 sm:$0xff]   ;;  %vm461_vm0 = vcmask 261120   ;;  %v423_v13 = vld [vmem:[%s5145_s24 + $0x18] sm:$0xf] }
  0x53   : > { %481 = vmatpush1.bf16.msra.mxu0 %v4565_v2  ;;  %v4571_v8 = vld [vmem:[#allocation7 + $0x10] ss:$8 sps:$4 sm:$0xff]   ;;  %v4572_v9 = vld [vmem:[#allocation7 + $0x4] ss:$8 sps:$4 sm:$0xff]   ;;  %v434_v10 = vpack.c.bf16 %v431_v6, %v430_v5  ;;  %4494 = vmatprep.subr.bf16.mxu1 %v4569_v7  ;;  %v4574_v11 = vld [vmem:[#allocation7] ss:$8 sps:$4 sm:$0xff]  }
  0x54   : > { %482 = vmatprep.subr.bf16.mxu0 %v4566_v3  ;;  %4496 = vmatpush1.bf16.msra.mxu1 %v4571_v8  ;;  %v422_v12 = vld [vmem:[%s5145_s24 + $0x10] sm:$0xff]  ;;  %v433_v17 = vld [vmem:[%s5145_s24 + $0x19] sm:$0xf]  ;;  %v4586_v20 = vld [vmem:[#allocation7 + $0x64] ss:$8 sps:$4 sm:$0xff]   ;;  %vm1919_vm2 = vcmask 228352  }
  0x55   : > { %4495 = vmatprep.subr.bf16.mxu1 %v4572_v9  ;;  %v432_v14 = vld [vmem:[%s5145_s24 + $0x11] sm:$0xff]  ;;  %v425_v15 = vpack.c.bf16 %v423_v13, %v422_v12  ;;  %v4584_v22 = vld [vmem:[#allocation7 + $0x60] ss:$8 sps:$4 sm:$0xff]   ;;  %v4598_v30 = vld [vmem:[#allocation7 + $0xa4] ss:$8 sps:$4 sm:$0xff]   ;;  %vm1926_vm6 = vcmask 1043456  }
  0x56   : > { %v4580_v16 = vld [vmem:[#allocation7 + $0x74] ss:$8 sps:$4 sm:$0xff]   ;;  %v4578_v18 = vld [vmem:[#allocation7 + $0x70] ss:$8 sps:$4 sm:$0xff]   ;;  %v435_v21 = vpack.c.bf16 %v433_v17, %v432_v14  ;;  %v698_v23 = vld [vmem:[%s5145_s24 + $0x3] sm:$0xff]  ;;  %vm4957_vm7 = vmmov 0  }
  0x57   : > { %483 = vmatpush1.bf16.msra.mxu0 %v4568_v4  ;;  %v4577_v19 = vld [vmem:[#allocation7 + $0x54] ss:$8 sps:$4 sm:$0xff]   ;;  %v699_v24 = vld [vmem:[%s5145_s24 + $0xb] sm:$0xff]  ;;  %v420_v25 = vld [vmem:[%s5145_s24] sm:$0xff]  ;;  %vm2847_vm8 = vcmask 1041408   ;;  %vm2844_vm9 = vcmask 80896  }
  0x58   : > { %559 = vmatprep.subr.bf16.mxu0 %v4569_v7  ;;  %4497 = vmatpush1.bf16.msra.mxu1 %v4574_v11  ;;  %v702_v26 = vpack.c.bf16 %v699_v24, %v698_v23  ;;  %v4592_v27 = vld [vmem:[#allocation7 + $0xb4] ss:$8 sps:$4 sm:$0xff]   ;;  %v421_v28 = vld [vmem:[%s5145_s24 + $0x8] sm:$0xff]  ;;  %v4590_v29 = vld [vmem:[#allocation7 + $0xb0] ss:$8 sps:$4 sm:$0xff]   ;;  %vm3597_vm10 = vcmask 982016  }
  0x59   : > { %747 = vmatprep.subr.bf16.mxu1 %v4580_v16  ;;  %v424_v31 = vpack.c.bf16 %v421_v28, %v420_v25  ;;  %v4575_v32 = vld [vmem:[#allocation7 + $0x50] ss:$8 sps:$4 sm:$0xff]   ;;  %v4583_v35 = vld [vmem:[#allocation7 + $0x44] ss:$8 sps:$4 sm:$0xff]   ;;  %v4596_v36 = vld [vmem:[#allocation7 + $0xa0] ss:$8 sps:$4 sm:$0xff]  }
  0x5a   : > { %3840 = vmatmul.mubr.msk.bf16.vlgmr.msra.gmra.mxu0 %vm461_vm0, %v434_v10  ;;  %v700_v33 = vld [vmem:[%s5145_s24 + $0x13] sm:$0xff]  ;;  %v701_v34 = vld [vmem:[%s5145_s24 + $0x1b] sm:$0xf]  ;;  %v4581_v37 = vld [vmem:[#allocation7 + $0x40] ss:$8 sps:$4 sm:$0xff]   ;;  %vm3691_vm11 = vcmask 687104  }
  0x5b   : > { %510 = vmatprep.mubr.bf16.mxu0 %v6019_v0  ;;  %560 = vmatpush1.bf16.msra.mxu0 %v4571_v8  ;;  %v703_v38 = vpack.c.bf16 %v701_v34, %v700_v33  ;;  %v4604_v39 = vld [vmem:[#allocation7 + $0xf4] ss:$8 sps:$4 sm:$0xff]   ;;  %v600_v40 = vld [vmem:[%s5145_s24 + $0x2] sm:$0xff]  ;;  %v601_v41 = vld [vmem:[%s5145_s24 + $0xa] sm:$0xff]  ;;  %s4240_s12 = sshll.u32 %s5040_s21, 4  ;;  %vm3738_vm12 = vcmask 73728  }
  0x5c   : > { %561 = vmatprep.subr.bf16.mxu0 %v4572_v9  ;;  %3847 = vmatmul.mubr.msk.bf16.vlgmr.msra.gmra.mxu1 %vm461_vm0, %v425_v15  ;;  %v4589_v42 = vld [vmem:[#allocation7 + $0x94] ss:$8 sps:$4 sm:$0xff]   ;;  %v604_v43 = vpack.c.bf16 %v601_v41, %v600_v40  ;;  %v4587_v44 = vld [vmem:[#allocation7 + $0x90] ss:$8 sps:$4 sm:$0xff]   ;;  %v3866_v45 = vld [vmem:[%s5145_s24 + $0x20] sm:$0xff]  ;;  %s5954_s14 = scalar_lea.hbm %s6008_s11, %s4240_s12  ;;  %s3741_s16 = scalar_lea.sflag [#allocation6], %s5141_s27 }
  0x5d   : > { %748 = vmatpush1.bf16.msra.mxu1 %v4578_v18  ;;  %767 = vmatprep.mubr.bf16.mxu1 %v6019_v0  ;;  %v3867_v46 = vld [vmem:[%s5145_s24 + $0x28] sm:$0xff]  ;;  %v602_v48 = vld [vmem:[%s5145_s24 + $0x12] sm:$0xff]  ;;  %v603_v49 = vld [vmem:[%s5145_s24 + $0x1a] sm:$0xf]  ;;  %p6086_p5 = scmp.ne.s32.totalorder %s6040_s13, 0  ;;  %s4958_s22 = smov [#allocation9]  }
  0x5e   : > { %749 = vmatprep.subr.bf16.mxu1 %v4586_v20  ;;  %v4595_v47 = vld [vmem:[#allocation7 + $0x84] ss:$8 sps:$4 sm:$0xff]   ;;  %v899_v50 = vpack.c.bf16 %v3867_v46, %v3866_v45  ;;  %v4593_v51 = vld [vmem:[#allocation7 + $0x80] ss:$8 sps:$4 sm:$0xff]   ;;  %v4601_v52 = vld [vmem:[#allocation7 + $0xd4] ss:$8 sps:$4 sm:$0xff]   ;;  %v605_v55 = vpack.c.bf16 %v603_v49, %v602_v48 }
  0x5f   : > { %562 = vmatpush1.bf16.msra.mxu0 %v4574_v11  ;;  %v4602_v53 = vld [vmem:[#allocation7 + $0xf0] ss:$8 sps:$4 sm:$0xff]   ;;  %v4610_v54 = vld [vmem:[#allocation7 + $0xe4] ss:$8 sps:$4 sm:$0xff]   ;;  %v4608_v58 = vld [vmem:[#allocation7 + $0xe0] ss:$8 sps:$4 sm:$0xff]  }
  0x60   : > { %649 = vmatprep.subr.bf16.mxu0 %v4577_v19  ;;  %v3868_v56 = vld [vmem:[%s5145_s24 + $0x30] sm:$0xff]  ;;  %v3869_v57 = vld [vmem:[%s5145_s24 + $0x38] sm:$0xf]  ;;  %v796_v61 = vld [vmem:[%s5145_s24 + $0x4] sm:$0xff]  ;;  %s4885_s28 = sshll.u32 %s4958_s22, 4  ;;  %s4886_s28 = int_to_ptr.vmem [resolvable:$false] %s4885_s28 }
  0x61   : > { %750 = vmatpush1.bf16.msra.mxu1 %v4584_v22  ;;  %v4616_v59 = vld [vmem:[#allocation7 + $0x134] ss:$8 sps:$4 sm:$0xff]   ;;  %v900_v60 = vpack.c.bf16 %v3869_v57, %v3868_v56  ;;  %v797_v62 = vld [vmem:[%s5145_s24 + $0xc] sm:$0xff]  ;;  %v3886_v2 = vld [vmem:[%s5145_s24 + $0x22] sm:$0xff]  ;;  %s4887_s30 = scalar_lea.vmem %s4886_s28, 32 }
  0x62   : > { %3841 = vmatmul.mubr.msk.bf16.gmra.mxu0 %vm461_vm0, %v435_v21  ;;  %944 = vmatprep.subr.bf16.mxu1 %v4592_v27  ;;  %v800_v63 = vpack.c.bf16 %v797_v62, %v796_v61  ;;  %v4599_v1 = vld [vmem:[#allocation7 + $0xd0] ss:$8 sps:$4 sm:$0xff]   ;;  %v4607_v4 = vld [vmem:[#allocation7 + $0xc4] ss:$8 sps:$4 sm:$0xff]   ;;  %v799_v6 = vld [vmem:[%s5145_s24 + $0x1c] sm:$0xf] }
  0x63   : > { %579 = vmatprep.mubr.bf16.mxu0 %v6019_v0  ;;  %v3887_v3 = vld [vmem:[%s5145_s24 + $0x2a] sm:$0xff]  ;;  %v798_v5 = vld [vmem:[%s5145_s24 + $0x14] sm:$0xff]  ;;  %v3876_v18 = vld [vmem:[%s5145_s24 + $0x21] sm:$0xff] }
  0x64   : > { %3858 = vmatmul.mubr.msk.bf16.vlgmr.msra.gmra.mxu1 %vm461_vm0, %v702_v26  ;;  %v1095_v7 = vpack.c.bf16 %v3887_v3, %v3886_v2  ;;  %v4605_v8 = vld [vmem:[#allocation7 + $0xc0] ss:$8 sps:$4 sm:$0xff]   ;;  %v4613_v9 = vld [vmem:[#allocation7 + $0x114] ss:$8 sps:$4 sm:$0xff]   ;;  %v4614_v10 = vld [vmem:[#allocation7 + $0x130] ss:$8 sps:$4 sm:$0xff]   ;;  %v801_v12 = vpack.c.bf16 %v799_v6, %v798_v5 }
  0x65   : > { %777 = vmatprep.mubr.bf16.mxu1 %v6019_v0  ;;  %945 = vmatpush1.bf16.msra.mxu1 %v4590_v29  ;;  %v4622_v11 = vld [vmem:[#allocation7 + $0x124] ss:$8 sps:$4 sm:$0xff]   ;;  %v3888_v13 = vld [vmem:[%s5145_s24 + $0x32] sm:$0xff]  ;;  %v3889_v14 = vld [vmem:[%s5145_s24 + $0x3a] sm:$0xf] }
  0x66   : > { %946 = vmatprep.subr.bf16.mxu1 %v4598_v30  ;;  %v4620_v15 = vld [vmem:[#allocation7 + $0x120] ss:$8 sps:$4 sm:$0xff]   ;;  %v4628_v16 = vld [vmem:[#allocation7 + $0x174] ss:$8 sps:$4 sm:$0xff]   ;;  %v1096_v17 = vpack.c.bf16 %v3889_v14, %v3888_v13  ;;  %v4611_v20 = vld [vmem:[#allocation7 + $0x110] ss:$8 sps:$4 sm:$0xff]  }
  0x67   : > { %v3877_v19 = vld [vmem:[%s5145_s24 + $0x29] sm:$0xff]  ;;  %v3878_v25 = vld [vmem:[%s5145_s24 + $0x31] sm:$0xff]  ;;  %v3879_v26 = vld [vmem:[%s5145_s24 + $0x39] sm:$0xf] }
  0x68   : > { %v3906_v21 = vld [vmem:[%s5145_s24 + $0x24] sm:$0xff]  ;;  %v3907_v22 = vld [vmem:[%s5145_s24 + $0x2c] sm:$0xff]  ;;  %v997_v23 = vpack.c.bf16 %v3877_v19, %v3876_v18  ;;  %v4625_v29 = vld [vmem:[#allocation7 + $0x154] ss:$8 sps:$4 sm:$0xff]   ;;  %v998_v34 = vpack.c.bf16 %v3879_v26, %v3878_v25 }
  0x69   : > { %947 = vmatpush1.bf16.msra.mxu1 %v4596_v36  ;;  %v4619_v24 = vld [vmem:[#allocation7 + $0x104] ss:$8 sps:$4 sm:$0xff]   ;;  %v4617_v27 = vld [vmem:[#allocation7 + $0x100] ss:$8 sps:$4 sm:$0xff]   ;;  %v1291_v28 = vpack.c.bf16 %v3907_v22, %v3906_v21  ;;  %v4626_v30 = vld [vmem:[#allocation7 + $0x170] ss:$8 sps:$4 sm:$0xff]  }
  0x6a   : > { %3846 = vmatmul.mubr.msk.bf16.vlgmr.msra.gmra.mxu0 %vm461_vm0, %v424_v31  ;;  %1140 = vmatprep.subr.bf16.mxu1 %v4604_v39  ;;  %v4634_v31 = vld [vmem:[#allocation7 + $0x164] ss:$8 sps:$4 sm:$0xff]   ;;  %v3909_v33 = vld [vmem:[%s5145_s24 + $0x3c] sm:$0xf]  ;;  %v4623_v40 = vld [vmem:[#allocation7 + $0x150] ss:$8 sps:$4 sm:$0xff]  }
  0x6b   : > { %650 = vmatpush1.bf16.msra.mxu0 %v4575_v32  ;;  %669 = vmatprep.mubr.bf16.mxu0 %v6019_v0  ;;  %v3908_v32 = vld [vmem:[%s5145_s24 + $0x34] sm:$0xff]  ;;  %v3926_v41 = vld [vmem:[%s5145_s24 + $0x41] sm:$0xff]  ;;  %v3947_v61 = vld [vmem:[%s5145_s24 + $0x4b] sm:$0xff] }
  0x6c   : > { %651 = vmatprep.subr.bf16.mxu0 %v4583_v35  ;;  %3859 = vmatmul.mubr.msk.bf16.gmra.mxu1 %vm461_vm0, %v703_v38  ;;  %v4632_v35 = vld [vmem:[#allocation7 + $0x160] ss:$8 sps:$4 sm:$0xff]   ;;  %v4640_v36 = vld [vmem:[#allocation7 + $0x1b4] ss:$8 sps:$4 sm:$0xff]   ;;  %v1292_v39 = vpack.c.bf16 %v3909_v33, %v3908_v32  ;;  %v3919_v2 = vld [vmem:[%s5145_s24 + $0x58] sm:$0xf] }
  0x6d   : > { %964 = vmatprep.mubr.bf16.mxu1 %v6019_v0  ;;  %v3897_v38 = vld [vmem:[%s5145_s24 + $0x2b] sm:$0xff]  ;;  %v3898_v45 = vld [vmem:[%s5145_s24 + $0x33] sm:$0xff]  ;;  %v3899_v46 = vld [vmem:[%s5145_s24 + $0x3b] sm:$0xf] }
  0x6e   : > { %v4637_v49 = vld [vmem:[#allocation7 + $0x194] ss:$8 sps:$4 sm:$0xff]   ;;  %v3916_v56 = vld [vmem:[%s5145_s24 + $0x40] sm:$0xff]  ;;  %v3917_v57 = vld [vmem:[%s5145_s24 + $0x48] sm:$0xff] }
  0x6f   : > { %652 = vmatpush1.bf16.msra.mxu0 %v4581_v37  ;;  %v3896_v37 = vld [vmem:[%s5145_s24 + $0x23] sm:$0xff]  ;;  %v1390_v62 = vpack.c.bf16 %v3917_v57, %v3916_v56  ;;  %v4649_v5 = vld [vmem:[#allocation7 + $0x1d4] ss:$8 sps:$4 sm:$0xff]  }
  0x70   : > { %845 = vmatprep.subr.bf16.mxu0 %v4589_v42  ;;  %v3927_v42 = vld [vmem:[%s5145_s24 + $0x49] sm:$0xff]  ;;  %v3948_v6 = vld [vmem:[%s5145_s24 + $0x53] sm:$0xff] }
  0x71   : > { %v1488_v48 = vpack.c.bf16 %v3927_v42, %v3926_v41  ;;  %v4641_v3 = vld [vmem:[#allocation7 + $0x180] ss:$8 sps:$4 sm:$0xff]   ;;  %v4652_v14 = vld [vmem:[#allocation7 + $0x1c4] ss:$8 sps:$4 sm:$0xff]   ;;  %v3958_v22 = vld [vmem:[%s5145_s24 + $0x54] sm:$0xff] }
  0x72   : > { %3852 = vmatmul.mubr.msk.bf16.vlgmr.msra.gmra.mxu0 %vm461_vm0, %v604_v43  ;;  %v1193_v43 = vpack.c.bf16 %v3897_v38, %v3896_v37  ;;  %v3956_v19 = vld [vmem:[%s5145_s24 + $0x44] sm:$0xff]  ;;  %v1878_v37 = vlaneseq }
  0x73   : > { %679 = vmatprep.mubr.bf16.mxu0 %v6019_v0  ;;  %846 = vmatpush1.bf16.msra.mxu0 %v4587_v44  ;;  %v4631_v44 = vld [vmem:[#allocation7 + $0x144] ss:$8 sps:$4 sm:$0xff]  }
  0x74   : > { %847 = vmatprep.subr.bf16.mxu0 %v4595_v47  ;;  %3874 = vmatmul.mubr.msk.bf16.vlgmr.msra.gmra.mxu1 %vm461_vm0, %v899_v50  ;;  %v4629_v47 = vld [vmem:[#allocation7 + $0x140] ss:$8 sps:$4 sm:$0xff]   ;;  %v4638_v50 = vld [vmem:[#allocation7 + $0x1b0] ss:$8 sps:$4 sm:$0xff]  }
  0x75   : > { %974 = vmatprep.mubr.bf16.mxu1 %v6019_v0  ;;  %1141 = vmatpush1.bf16.msra.mxu1 %v4602_v53  ;;  %v3929_v53 = vld [vmem:[%s5145_s24 + $0x59] sm:$0xf] }
  0x76   : > { %1142 = vmatprep.subr.bf16.mxu1 %v4610_v54  ;;  %v1194_v54 = vpack.c.bf16 %v3899_v46, %v3898_v45 }
  0x77   : > { %848 = vmatpush1.bf16.msra.mxu0 %v4593_v51  ;;  %v4646_v51 = vld [vmem:[#allocation7 + $0x1a4] ss:$8 sps:$4 sm:$0xff]  }
  0x78   : > { %1042 = vmatprep.subr.bf16.mxu0 %v4601_v52  ;;  %v3928_v52 = vld [vmem:[%s5145_s24 + $0x51] sm:$0xff] }
  0x79   : > { %1143 = vmatpush1.bf16.msra.mxu1 %v4608_v58  ;;  %v1489_v58 = vpack.c.bf16 %v3929_v53, %v3928_v52 }
  0x7a   : > { %3853 = vmatmul.mubr.msk.bf16.gmra.mxu0 %vm461_vm0, %v605_v55  ;;  %1336 = vmatprep.subr.bf16.mxu1 %v4616_v59  ;;  %v4644_v55 = vld [vmem:[#allocation7 + $0x1a0] ss:$8 sps:$4 sm:$0xff]   ;;  %v4635_v59 = vld [vmem:[#allocation7 + $0x190] ss:$8 sps:$4 sm:$0xff]  }
  0x7b   : > { %865 = vmatprep.mubr.bf16.mxu0 %v6019_v0 }
  0x7c   : > { %3875 = vmatmul.mubr.msk.bf16.gmra.mxu1 %vm461_vm0, %v900_v60  ;;  %v3946_v60 = vld [vmem:[%s5145_s24 + $0x43] sm:$0xff] }
  0x7d   : > { %1160 = vmatprep.mubr.bf16.mxu1 %v6019_v0 }
  0x82   : > { %3864 = vmatmul.mubr.msk.bf16.vlgmr.msra.gmra.mxu0 %vm461_vm0, %v800_v63  ;;  %v4643_v63 = vld [vmem:[#allocation7 + $0x184] ss:$8 sps:$4 sm:$0xff]  }
  0x83   : > { %875 = vmatprep.mubr.bf16.mxu0 %v6019_v0  ;;  %1043 = vmatpush1.bf16.msra.mxu0 %v4599_v1  ;;  %v3918_v1 = vld [vmem:[%s5145_s24 + $0x50] sm:$0xff] }
  0x84   : > { %1044 = vmatprep.subr.bf16.mxu0 %v4607_v4  ;;  %3894 = vmatmul.mubr.msk.bf16.vlgmr.msra.gmra.mxu1 %vm461_vm0, %v1095_v7  ;;  %v1684_v4 = vpack.c.bf16 %v3947_v61, %v3946_v60  ;;  %v3949_v7 = vld [vmem:[%s5145_s24 + $0x5b] sm:$0xf]  ;;  %v6050_v60 = vmov 0 }
  0x85   : > { %1170 = vmatprep.mubr.bf16.mxu1 %v6019_v0  ;;  %1337 = vmatpush1.bf16.msra.mxu1 %v4614_v10  ;;  %v3937_v10 = vld [vmem:[%s5145_s24 + $0x4a] sm:$0xff] }
  0x86   : > { %1338 = vmatprep.subr.bf16.mxu1 %v4622_v11  ;;  %v1685_v11 = vpack.c.bf16 %v3949_v7, %v3948_v6 }
  0x87   : > { %1045 = vmatpush1.bf16.msra.mxu0 %v4605_v8  ;;  %v1391_v8 = vpack.c.bf16 %v3919_v2, %v3918_v1 }
  0x88   : > { %1238 = vmatprep.subr.bf16.mxu0 %v4613_v9  ;;  %v3936_v9 = vld [vmem:[%s5145_s24 + $0x42] sm:$0xff] }
  0x89   : > { %1339 = vmatpush1.bf16.msra.mxu1 %v4620_v15  ;;  %v1586_v13 = vpack.c.bf16 %v3937_v10, %v3936_v9  ;;  %v3938_v15 = vld [vmem:[%s5145_s24 + $0x52] sm:$0xff] }
  0x8a   : > { %3865 = vmatmul.mubr.msk.bf16.gmra.mxu0 %vm461_vm0, %v801_v12  ;;  %1533 = vmatprep.subr.bf16.mxu1 %v4628_v16  ;;  %v4647_v12 = vld [vmem:[#allocation7 + $0x1d0] ss:$8 sps:$4 sm:$0xff]  }
  0x8b   : > { %1062 = vmatprep.mubr.bf16.mxu0 %v6019_v0  ;;  %v3939_v16 = vld [vmem:[%s5145_s24 + $0x5a] sm:$0xf] }
  0x8c   : > { %3895 = vmatmul.mubr.msk.bf16.gmra.mxu1 %vm461_vm0, %v1096_v17  ;;  %v4650_v17 = vld [vmem:[#allocation7 + $0x1c0] ss:$8 sps:$4 sm:$0xff]   ;;  %v1587_v18 = vpack.c.bf16 %v3939_v16, %v3938_v15 }
  0x8d   : > { %1356 = vmatprep.mubr.bf16.mxu1 %v6019_v0 }
  0x92   : > { %3884 = vmatmul.mubr.msk.bf16.vlgmr.msra.gmra.mxu0 %vm461_vm0, %v997_v23  ;;  %v3959_v23 = vld [vmem:[%s5145_s24 + $0x5c] sm:$0xf] }
  0x93   : > { %1072 = vmatprep.mubr.bf16.mxu0 %v6019_v0  ;;  %1239 = vmatpush1.bf16.msra.mxu0 %v4611_v20  ;;  %v3957_v20 = vld [vmem:[%s5145_s24 + $0x4c] sm:$0xff]  ;;  %s418_s24 = scalar_lea.vmem [#allocation9], %s5141_s27 }
  0x94   : > { %1240 = vmatprep.subr.bf16.mxu0 %v4619_v24  ;;  %3914 = vmatmul.mubr.msk.bf16.vlgmr.msra.gmra.mxu1 %vm461_vm0, %v1291_v28  ;;  %v1782_v21 = vpack.c.bf16 %v3957_v20, %v3956_v19  ;;  %v1783_v24 = vpack.c.bf16 %v3959_v23, %v3958_v22  ;;  %v4655_v19 = vld [vmem:[%s6000_s3 + $0xf4] ss:$8 sps:$4 sm:$0xff]   ;;  %v4661_v22 = vld [vmem:[%s6000_s3 + $0xe4] ss:$8 sps:$4 sm:$0xff]   ;;  %s3753_s17 = sshll.u32 %s418_s24, 4  ;;  %s5956_s17 = int_to_ptr.vmem [resolvable:$true] %s3753_s17 }
  0x95   : > { %1366 = vmatprep.mubr.bf16.mxu1 %v6019_v0  ;;  %1534 = vmatpush1.bf16.msra.mxu1 %v4626_v30  ;;  %s4881_s21 = scalar_lea.vmem %s5956_s17, 16  ;;  %p4888_p10 = scmp.lt.s32.totalorder %s5956_s17, %s4886_s28 }
  0x96   : > { %1535 = vmatprep.subr.bf16.mxu1 %v4634_v31  ;;  %p4882_p3 = scmp.ne.s32.totalorder %s5956_s17, %s4881_s21  ;;  %p4889_p12 = scmp.lt.s32.totalorder %s4887_s30, %s4881_s21 }
  0x97   : > { %1241 = vmatpush1.bf16.msra.mxu0 %v4617_v27 }
  0x98   : > { %1435 = vmatprep.subr.bf16.mxu0 %v4625_v29  ;;  %p4883_p7 = pnand %p4882_p3, %p6086_p5  ;;  %p4890_p13 = por %p4889_p12, %p4888_p10 }
  0x99   : > { %1536 = vmatpush1.bf16.msra.mxu1 %v4632_v35 }
  0x9a   : > { %3885 = vmatmul.mubr.msk.bf16.gmra.mxu0 %vm461_vm0, %v998_v34  ;;  %1729 = vmatprep.subr.bf16.mxu1 %v4640_v36  ;;  %p4884_p9 = pneg %p4883_p7 }
  0x9b   : > { %1258 = vmatprep.mubr.bf16.mxu0 %v6019_v0 }
  0x9c   : > { %3915 = vmatmul.mubr.msk.bf16.gmra.mxu1 %vm461_vm0, %v1292_v39  ;;  %p4891_p0 = pnand %p4890_p13, %p4884_p9 }
  0x9d   : > { %1553 = vmatprep.mubr.bf16.mxu1 %v6019_v0 }
  0xa2   : > { %3904 = vmatmul.mubr.msk.bf16.vlgmr.msra.gmra.mxu0 %vm461_vm0, %v1193_v43 }
  0xa3   : > { %1268 = vmatprep.mubr.bf16.mxu0 %v6019_v0  ;;  %1436 = vmatpush1.bf16.msra.mxu0 %v4623_v40 }
  0xa4   : > { %1437 = vmatprep.subr.bf16.mxu0 %v4631_v44  ;;  %3934 = vmatmul.mubr.msk.bf16.vlgmr.msra.gmra.mxu1 %vm461_vm0, %v1488_v48  ;;  %v5280_v44 = vshrl.u32 %v1878_v37, 7 }
  0xa5   : > { %1563 = vmatprep.mubr.bf16.mxu1 %v6019_v0  ;;  %1730 = vmatpush1.bf16.msra.mxu1 %v4638_v50 }
  0xa6   : > { %1731 = vmatprep.subr.bf16.mxu1 %v4646_v51  ;;  %v1910_v48 = vadd.s32 8, %v5280_v44  ;;  %v5283_v51 = vand.u32 127, %v1878_v37  ;;  %v1913_v52 = vmul.u32 2, %v5280_v44 }
  0xa7   : > { %1438 = vmatpush1.bf16.msra.mxu0 %v4629_v47 }
  0xa8   : > { %1631 = vmatprep.subr.bf16.mxu0 %v4637_v49  ;;  %6048 = vst [vmem:[#allocation17_spill] sm:$0xff] %v5283_v51  ;;  %vm1915_vm1 = vcmp.eq.s32.totalorder %v5283_v51, %v1913_v52  ;;  %v5301_v6 = vadd.s32 1, %v1913_v52 }
  0xa9   : > { %1732 = vmatpush1.bf16.msra.mxu1 %v4644_v55 }
  0xaa   : > { %3905 = vmatmul.mubr.msk.bf16.gmra.mxu0 %vm461_vm0, %v1194_v54  ;;  %v1914_v54 = vmul.u32 2, %v1910_v48  ;;  %6053 = vst [vmem:[#allocation20_spill] sm:$0xff] %v5301_v6  ;;  %vm2007_vm4 = vcmp.eq.s32.totalorder %v5283_v51, %v5301_v6 }
  0xab   : > { %1455 = vmatprep.mubr.bf16.mxu0 %v6019_v0 }
  0xac   : > { %3935 = vmatmul.mubr.msk.bf16.gmra.mxu1 %vm461_vm0, %v1489_v58  ;;  %v6021_v58 = vmov 0.0   ;;  %vm5291_vm3 = vcmp.eq.s32.totalorder %v5283_v51, %v1914_v54  ;;  %v5303_v9 = vadd.s32 1, %v1914_v54 }
  0xad   : > { %1749 = vmatprep.mubr.bf16.mxu1 %v6019_v0  ;;  %v6051_v60 = vsel %vm5291_vm3, 4294967295, %v6050_v60 }
  0xae   : > { %6052 = vst [vmem:[#allocation19_spill] sm:$0xff] %v6051_v60  ;;  %6054 = vst [vmem:[#allocation21_spill] sm:$0xff] %v5303_v9  ;;  %vm2008_vm5 = vcmp.eq.s32.totalorder %v5283_v51, %v5303_v9 }
  0xb2   : > { %3924 = vmatmul.mubr.msk.bf16.vlgmr.msra.gmra.mxu0 %vm461_vm0, %v1390_v62 }
  0xb3   : > { %1465 = vmatprep.mubr.bf16.mxu0 %v6019_v0  ;;  %1632 = vmatpush1.bf16.msra.mxu0 %v4635_v59  ;;  %v5288_v59 = vsel %vm1915_vm1, 1.0, %v6021_v58 }
  0xb4   : > { %1633 = vmatprep.subr.bf16.mxu0 %v4643_v63  ;;  %3954 = vmatmul.mubr.msk.bf16.vlgmr.msra.gmra.mxu1 %vm461_vm0, %v1684_v4  ;;  %6049 = vst [vmem:[#allocation18_spill] sm:$0xff] %v5288_v59 }
  0xb5   : > { %1759 = vmatprep.mubr.bf16.mxu1 %v6019_v0 }
  0xb7   : > { %1634 = vmatpush1.bf16.msra.mxu0 %v4641_v3 }
  0xb8   : > { %1827 = vmatprep.subr.bf16.mxu0 %v4649_v5 }
  0xba   : > { %3925 = vmatmul.mubr.msk.bf16.gmra.mxu0 %vm461_vm0, %v1391_v8 }
  0xbb   : > { %1651 = vmatprep.mubr.bf16.mxu0 %v6019_v0 }
  0xbc   : > { %3955 = vmatmul.mubr.msk.bf16.gmra.mxu1 %vm461_vm0, %v1685_v11 }
  0xbd   : > { %4330 = vmatprep.mubr.msk.f32.mxu1 %vm1919_vm2, %v5288_v59 }
  0xc2   : > { %3944 = vmatmul.mubr.msk.bf16.vlgmr.msra.gmra.mxu0 %vm461_vm0, %v1586_v13 }
  0xc3   : > { %1661 = vmatprep.mubr.bf16.mxu0 %v6019_v0  ;;  %1828 = vmatpush1.bf16.msra.mxu0 %v4647_v12 }
  0xc4   : > { %1829 = vmatprep.subr.bf16.mxu0 %v4652_v14 }
  0xc7   : > { %1830 = vmatpush1.bf16.msra.mxu0 %v4650_v17 }
  0xc8   : > { %2215 = vmatprep.subr.bf16.mxu0 %v4655_v19 }
  0xca   : > { %3945 = vmatmul.mubr.msk.bf16.gmra.mxu0 %vm461_vm0, %v1587_v18  ;;  %v4653_v18 = vld [vmem:[%s6000_s3 + $0xf0] ss:$8 sps:$4 sm:$0xff]  }
  0xcb   : > { %1847 = vmatprep.mubr.bf16.mxu0 %v6019_v0 }
  0xd2   : > { %3964 = vmatmul.mubr.msk.bf16.vlgmr.msra.gmra.mxu0 %vm461_vm0, %v1782_v21 }
  0xd3   : > { %1857 = vmatprep.mubr.bf16.mxu0 %v6019_v0  ;;  %2216 = vmatpush1.bf16.msra.mxu0 %v4653_v18 }
  0xd4   : > { %2217 = vmatprep.subr.bf16.mxu0 %v4661_v22 }
  0xda   : > { %3965 = vmatmul.mubr.msk.bf16.gmra.mxu0 %vm461_vm0, %v1783_v24 }
  0xdb   : > { %2247 = vmatprep.mubr.bf16.mxu0 %v6019_v0 }
 0x11a   : > { %v502_v25 = vpop.f32.mrf.mxu0 }
 0x11c   : > { %v504_v26 = vpop.f32.mrf.mxu0  ;;  %v591_v28 = vpop.f32.mrf.mxu1 }
 0x11e   : > { %v506_v27 = vpop.f32.mrf.mxu0  ;;  %v593_v30 = vpop.f32.mrf.mxu1 }
 0x120   : > { %v508_v29 = vpop.f32.mrf.mxu0  ;;  %v595_v32 = vpop.f32.mrf.mxu1 }
 0x122   : > { %v512_v31 = vpop.f32.mrf.mxu0  ;;  %v597_v35 = vpop.f32.mrf.mxu1 }
 0x123   : > { %v592_v33 = vadd.f32 %v591_v28, %v512_v31 }
 0x124   : > { %v514_v34 = vpop.f32.mrf.mxu0  ;;  %v769_v39 = vpop.f32.mrf.mxu1 }
 0x125   : > { %v594_v36 = vadd.f32 %v593_v30, %v514_v34 }
 0x126   : > { %v516_v38 = vpop.f32.mrf.mxu0  ;;  %v771_v42 = vpop.f32.mrf.mxu1 }
 0x127   : > { %v5276_v40 = vadd.f32 %v595_v32, %v516_v38  ;;  %v4667_v32 = vld [vmem:[%s6000_s3 + $0xd4] ss:$8 sps:$4 sm:$0xff]  }
 0x128   : > { %v518_v41 = vpop.f32.mrf.mxu0  ;;  %v773_v46 = vpop.f32.mrf.mxu1 }
 0x129   : > { %v5278_v43 = vadd.f32 %v597_v35, %v518_v41 }
 0x12a   : > { %v581_v45 = vpop.f32.mrf.mxu0  ;;  %v775_v50 = vpop.f32.mrf.mxu1 }
 0x12b   : > { %v582_v47 = vadd.f32 %v581_v45, %v502_v25 }
 0x12c   : > { %v583_v49 = vpop.f32.mrf.mxu0  ;;  %v779_v56 = vpop.f32.mrf.mxu1 }
 0x12d   : > { %v584_v53 = vadd.f32 %v583_v49, %v504_v26 }
 0x12e   : > { %v585_v55 = vpop.f32.mrf.mxu0  ;;  %v781_v62 = vpop.f32.mrf.mxu1 }
 0x12f   : > { %v586_v57 = vadd.f32 %v585_v55, %v506_v27  ;;  %v4659_v27 = vld [vmem:[%s6000_s3 + $0xe0] ss:$8 sps:$4 sm:$0xff]  }
 0x130   : > { %v587_v61 = vpop.f32.mrf.mxu0  ;;  %v5297_v2 = vpop.f32.mrf.mxu1  ;;  %2218 = vmatpush1.bf16.msra.mxu0 %v4659_v27 }
 0x131   : > { %v588_v63 = vadd.f32 %v587_v61, %v508_v29  ;;  %2219 = vmatprep.subr.bf16.mxu0 %v4667_v32 }
 0x132   : > { %v671_v1 = vpop.f32.mrf.mxu0  ;;  %v5299_v5 = vpop.f32.mrf.mxu1 }
 0x133   : > { %v690_v3 = vadd.f32 %v671_v1, %v582_v47 }
 0x134   : > { %v673_v4 = vpop.f32.mrf.mxu0  ;;  %v966_v11 = vpop.f32.mrf.mxu1 }
 0x135   : > { %v691_v7 = vadd.f32 %v673_v4, %v584_v53  ;;  %v788_v8 = vadd.f32 %v769_v39, %v690_v3 }
 0x136   : > { %v675_v10 = vpop.f32.mrf.mxu0  ;;  %v968_v15 = vpop.f32.mrf.mxu1 }
 0x137   : > { %v692_v12 = vadd.f32 %v675_v10, %v586_v57  ;;  %v789_v13 = vadd.f32 %v771_v42, %v691_v7 }
 0x138   : > { %v677_v14 = vpop.f32.mrf.mxu0  ;;  %v5315_v21 = vpop.f32.mrf.mxu1 }
 0x139   : > { %v693_v16 = vadd.f32 %v677_v14, %v588_v63  ;;  %v790_v17 = vadd.f32 %v773_v46, %v692_v12 }
 0x13a   : > { %v681_v20 = vpop.f32.mrf.mxu0  ;;  %v5320_v26 = vpop.f32.mrf.mxu1 }
 0x13b   : > { %v694_v23 = vadd.f32 %v681_v20, %v592_v33  ;;  %v791_v24 = vadd.f32 %v775_v50, %v693_v16 }
 0x13c   : > { %v683_v25 = vpop.f32.mrf.mxu0  ;;  %v5325_v31 = vpop.f32.mrf.mxu1 }
 0x13d   : > { %v695_v28 = vadd.f32 %v683_v25, %v594_v36  ;;  %v792_v29 = vadd.f32 %v779_v56, %v694_v23  ;;  %v4665_v36 = vld [vmem:[%s6000_s3 + $0xd0] ss:$8 sps:$4 sm:$0xff]  }
 0x13e   : > { %v685_v30 = vpop.f32.mrf.mxu0  ;;  %v5333_v37 = vpop.f32.mrf.mxu1  ;;  %2220 = vmatpush1.bf16.msra.mxu0 %v4665_v36 }
 0x13f   : > { %v5331_v33 = vadd.f32 %v685_v30, %v5276_v40  ;;  %v793_v34 = vadd.f32 %v781_v62, %v695_v28 }
 0x140   : > { %v687_v35 = vpop.f32.mrf.mxu0  ;;  %v5341_v41 = vpop.f32.mrf.mxu1 }
 0x141   : > { %v5339_v38 = vadd.f32 %v687_v35, %v5278_v43 }
 0x142   : > { %v867_v39 = vpop.f32.mrf.mxu0  ;;  %v5343_v40 = vpop.f32.mrf.mxu1 }
 0x143   : > { %v886_v42 = vadd.f32 %v867_v39, %v788_v8 }
 0x144   : > { %v869_v45 = vpop.f32.mrf.mxu0  ;;  %v1162_v49 = vpop.f32.mrf.mxu1 }
 0x145   : > { %v887_v46 = vadd.f32 %v869_v45, %v789_v13  ;;  %v985_v47 = vadd.f32 %v966_v11, %v886_v42 }
 0x146   : > { %v871_v48 = vpop.f32.mrf.mxu0  ;;  %v5345_v54 = vpop.f32.mrf.mxu1 }
 0x147   : > { %v888_v50 = vadd.f32 %v871_v48, %v790_v17  ;;  %v986_v52 = vadd.f32 %v968_v15, %v887_v46 }
 0x148   : > { %v873_v53 = vpop.f32.mrf.mxu0  ;;  %v5347_v56 = vpop.f32.mrf.mxu1 }
 0x149   : > { %v889_v43 = vadd.f32 %v873_v53, %v791_v24  ;;  %v987_v60 = vadd.f32 %v5315_v21, %v888_v50 }
 0x14a   : > { %v877_v55 = vpop.f32.mrf.mxu0  ;;  %v5349_v62 = vpop.f32.mrf.mxu1 }
 0x14b   : > { %v890_v57 = vadd.f32 %v877_v55, %v792_v29 }
 0x14c   : > { %v879_v61 = vpop.f32.mrf.mxu0  ;;  %v5351_v3 = vpop.f32.mrf.mxu1 }
 0x14d   : > { %v891_v63 = vadd.f32 %v879_v61, %v793_v34 }
 0x14e   : > { %v881_v1 = vpop.f32.mrf.mxu0  ;;  %v5353_v7 = vpop.f32.mrf.mxu1 }
 0x150   : > { %v883_v4 = vpop.f32.mrf.mxu0  ;;  %v5355_v10 = vpop.f32.mrf.mxu1 }
 0x152   : > { %v1064_v8 = vpop.f32.mrf.mxu0  ;;  %v5357_v13 = vpop.f32.mrf.mxu1 }
 0x153   : > { %v1083_v11 = vadd.f32 %v1064_v8, %v985_v47 }
 0x154   : > { %v1066_v12 = vpop.f32.mrf.mxu0  ;;  %v1358_v16 = vpop.f32.mrf.mxu1 }
 0x155   : > { %v1084_v14 = vadd.f32 %v1066_v12, %v986_v52 }
 0x156   : > { %v1068_v15 = vpop.f32.mrf.mxu0  ;;  %v5359_v18 = vpop.f32.mrf.mxu1 }
 0x157   : > { %v1182_v21 = vadd.f32 %v5345_v54, %v1084_v14 }
 0x158   : > { %v1070_v17 = vpop.f32.mrf.mxu0  ;;  %v5361_v20 = vpop.f32.mrf.mxu1 }
 0x15a   : > { %v1074_v19 = vpop.f32.mrf.mxu0  ;;  %v5363_v23 = vpop.f32.mrf.mxu1 }
 0x15c   : > { %v1076_v22 = vpop.f32.mrf.mxu0  ;;  %v5365_v25 = vpop.f32.mrf.mxu1 }
 0x15e   : > { %v1078_v24 = vpop.f32.mrf.mxu0  ;;  %v5367_v28 = vpop.f32.mrf.mxu1 }
 0x15f   : > { %6055 = vst [vmem:[#allocation22_spill] sm:$0xff] %v5367_v28 }
 0x160   : > { %v1080_v27 = vpop.f32.mrf.mxu0  ;;  %v5369_v30 = vpop.f32.mrf.mxu1 }
 0x161   : > { %6056 = vst [vmem:[#allocation23_spill] sm:$0xff] %v5369_v30  ;;  %v1181_v30 = vadd.f32 %v1162_v49, %v1083_v11 }
 0x162   : > { %v1260_v29 = vpop.f32.mrf.mxu0  ;;  %v5371_v34 = vpop.f32.mrf.mxu1 }
 0x163   : > { %6057 = vst [vmem:[#allocation24_spill] sm:$0xff] %v5371_v34  ;;  %v794_v34 = vadd.f32 %v5297_v2, %v5331_v33  ;;  %v1279_v28 = vadd.f32 %v1260_v29, %v1181_v30  ;;  %v990_v2 = vadd.f32 %v5333_v37, %v891_v63 }
 0x164   : > { %v1262_v32 = vpop.f32.mrf.mxu0  ;;  %v5373_v36 = vpop.f32.mrf.mxu1 }
 0x165   : > { %v1280_v49 = vadd.f32 %v1262_v32, %v1182_v21 }
 0x166   : > { %v1264_v35 = vpop.f32.mrf.mxu0  ;;  %v5375_v42 = vpop.f32.mrf.mxu1 }
 0x168   : > { %v1266_v39 = vpop.f32.mrf.mxu0  ;;  %v5377_v46 = vpop.f32.mrf.mxu1 }
 0x169   : > { %6058 = vst [vmem:[#allocation25_spill] sm:$0xff] %v5377_v46  ;;  %v795_v46 = vadd.f32 %v5299_v5, %v5339_v38  ;;  %v1088_v38 = vadd.f32 %v1076_v22, %v990_v2 }
 0x16a   : > { %v1270_v45 = vpop.f32.mrf.mxu0  ;;  %v5379_v48 = vpop.f32.mrf.mxu1 }
 0x16b   : > { %6059 = vst [vmem:[#allocation26_spill] sm:$0xff] %v5379_v48  ;;  %v893_v33 = vadd.f32 %v883_v4, %v795_v46 }
 0x16c   : > { %v1272_v47 = vpop.f32.mrf.mxu0  ;;  %v5383_v55 = vpop.f32.mrf.mxu1 }
 0x16d   : > { %6061 = vst [vmem:[#allocation28_spill] sm:$0xff] %v5383_v55  ;;  %v988_v55 = vadd.f32 %v5320_v26, %v889_v43  ;;  %v992_v54 = vadd.f32 %v5343_v40, %v893_v33 }
 0x16e   : > { %v1274_v52 = vpop.f32.mrf.mxu0  ;;  %v5385_v12 = vpop.f32.mrf.mxu1 }
 0x16f   : > { %6062 = vst [vmem:[#allocation29_spill] sm:$0xff] %v5385_v12  ;;  %v1085_v12 = vadd.f32 %v1068_v15, %v987_v60  ;;  %v1086_v50 = vadd.f32 %v1070_v17, %v988_v55  ;;  %v1186_v15 = vadd.f32 %v5353_v7, %v1088_v38 }
 0x170   : > { %v5381_v53 = vpop.f32.mrf.mxu0  ;;  %v5387_v59 = vpop.f32.mrf.mxu1 }
 0x171   : > { %6060 = vst [vmem:[#allocation27_spill] sm:$0xff] %v5381_v53  ;;  %6063 = vst [vmem:[#allocation30_spill] sm:$0xff] %v5387_v59  ;;  %v989_v59 = vadd.f32 %v5325_v31, %v890_v57  ;;  %v892_v53 = vadd.f32 %v881_v1, %v794_v34  ;;  %v1183_v60 = vadd.f32 %v5347_v56, %v1085_v12 }
 0x172   : > { %v1457_v61 = vpop.f32.mrf.mxu0  ;;  %v5391_v51 = vpop.f32.mrf.mxu1  ;;  %v1184_v57 = vadd.f32 %v5349_v62, %v1086_v50  ;;  %v1377_v1 = vadd.f32 %v1358_v16, %v1279_v28  ;;  %v1284_v40 = vadd.f32 %v1272_v47, %v1186_v15  ;;  %v6072_v21 = vld [vmem:[#allocation26_spill] sm:$0xff] }
 0x173   : > { %6065 = vst [vmem:[#allocation32_spill] sm:$0xff] %v5391_v51  ;;  %v991_v5 = vadd.f32 %v5341_v41, %v892_v53  ;;  %v1281_v11 = vadd.f32 %v1264_v35, %v1183_v60  ;;  %v1090_v41 = vadd.f32 %v1080_v27, %v992_v54  ;;  %v1884_v53 = vsub.s32 1, %v5280_v44 }
 0x174   : > { %v1459_v8 = vpop.f32.mrf.mxu0  ;;  %v1751_v51 = vpop.f32.mrf.mxu1  ;;  %v1282_v4 = vadd.f32 %v1266_v39, %v1184_v57  ;;  %v1476_v56 = vadd.f32 %v1457_v61, %v1377_v1 }
 0x175   : > { %v1089_v37 = vadd.f32 %v1078_v24, %v991_v5  ;;  %v1379_v62 = vadd.f32 %v5361_v20, %v1281_v11  ;;  %v1188_v30 = vadd.f32 %v5357_v13, %v1090_v41  ;;  %v6069_v13 = vld [vmem:[#allocation25_spill] sm:$0xff] }
 0x176   : > { %v1461_v0 = vpop.f32.mrf.mxu0  ;;  %v1753_v43 = vpop.f32.mrf.mxu1  ;;  %v1574_v24 = vadd.f32 %v5373_v36, %v1476_v56 }
 0x177   : > { %v1187_v28 = vadd.f32 %v5355_v10, %v1089_v37  ;;  %v1880_v10 = vsub.s32 0, %v5280_v44  ;;  %v6076_v37 = vld [vmem:[#allocation29_spill] sm:$0xff]  ;;  %v6085_v44 = vld [vmem:[#allocation18_spill] sm:$0xff] }
 0x178   : > { %v1463_v58 = vpop.f32.mrf.mxu0  ;;  %v1755_v22 = vpop.f32.mrf.mxu1  ;;  %v6068_v47 = vld [vmem:[#allocation27_spill] sm:$0xff] }
 0x179   : > { %v1285_v27 = vadd.f32 %v1274_v52, %v1187_v28 }
 0x17a   : > { %v1467_v9 = vpop.f32.mrf.mxu0  ;;  %v1757_v32 = vpop.f32.mrf.mxu1 }
 0x17c   : > { %v5389_v6 = vpop.f32.mrf.mxu0 }
 0x17d   : > { %6064 = vst [vmem:[#allocation31_spill] sm:$0xff] %v5389_v6 }
 0x17e   : > { %v5396_v48 = vpop.f32.mrf.mxu0 }
 0x17f   : > { %6066 = vst [vmem:[#allocation33_spill] sm:$0xff] %v5396_v48  ;;  %v1087_v48 = vadd.f32 %v1074_v19, %v989_v59  ;;  %v1378_v59 = vadd.f32 %v5359_v18, %v1280_v49  ;;  %v1478_v18 = vadd.f32 %v1461_v0, %v1379_v62  ;;  %v1876_v0 = vld [vmem:[%s5999_s2] sm:$0x3]  ;;  %v6074_v49 = vld [vmem:[#allocation28_spill] sm:$0xff]  ;;  %v6077_v62 = vld [vmem:[#allocation30_spill] sm:$0xff] }
 0x180   : > { %v5402_v6 = vpop.f32.mrf.mxu0  ;;  %v1881_v33 = vrot.slane %v1876_v0, %v1880_v10 }
 0x181   : > { %v1185_v14 = vadd.f32 %v5351_v3, %v1087_v48  ;;  %v1477_v16 = vadd.f32 %v1459_v8, %v1378_v59  ;;  %v1380_v3 = vadd.f32 %v5363_v23, %v1282_v4  ;;  %v1286_v23 = vadd.f32 %v6068_v47, %v1188_v30  ;;  %v1761_v8 = vpop.f32.mrf.mxu1 }
 0x182   : > { %v1653_v26 = vpop.f32.mrf.mxu0 }
 0x183   : > { %v1283_v17 = vadd.f32 %v1270_v45, %v1185_v14  ;;  %v1575_v35 = vadd.f32 %v5375_v42, %v1477_v16  ;;  %v1479_v20 = vadd.f32 %v1463_v58, %v1380_v3  ;;  %v1672_v39 = vadd.f32 %v1653_v26, %v1574_v24  ;;  %v6067_v45 = vld [vmem:[#allocation22_spill] sm:$0xff]  ;;  %v6070_v42 = vld [vmem:[#allocation23_spill] sm:$0xff]  ;;  %v6073_v26 = vld [vmem:[#allocation24_spill] sm:$0xff]  ;;  %v1763_v4 = vpop.f32.mrf.mxu1 }
 0x184   : > { %v1655_v31 = vpop.f32.mrf.mxu0  ;;  %v1382_v46 = vadd.f32 %v6067_v45, %v1284_v40  ;;  %v1383_v58 = vadd.f32 %v6070_v42, %v1285_v27  ;;  %v6071_v55 = vld [vmem:[#allocation31_spill] sm:$0xff]  ;;  %v1384_v60 = vadd.f32 %v6073_v26, %v1286_v23  ;;  %v1885_v14 = vrot.slane %v1876_v0, %v1884_v53  ;;  %v6078_v24 = vld [vmem:[#allocation32_spill] sm:$0xff] }
 0x185   : > { %v1381_v7 = vadd.f32 %v5365_v25, %v1283_v17  ;;  %v1576_v25 = vadd.f32 %v6069_v13, %v1478_v18  ;;  %v1673_v52 = vadd.f32 %v1655_v31, %v1575_v35  ;;  %v1577_v50 = vadd.f32 %v6072_v21, %v1479_v20  ;;  %v1765_v27 = vpop.f32.mrf.mxu1 }
 0x186   : > { %v1657_v63 = vpop.f32.mrf.mxu0  ;;  %v1481_v61 = vadd.f32 %v6071_v55, %v1382_v46  ;;  %v1770_v2 = vadd.f32 %v1751_v51, %v1672_v39  ;;  %v6075_v38 = vld [vmem:[#allocation33_spill] sm:$0xff]  ;;  %v1483_v51 = vadd.f32 %v5402_v6, %v1384_v60 }
 0x187   : > { %v1480_v48 = vadd.f32 %v1467_v9, %v1381_v7  ;;  %v1674_v9 = vadd.f32 %v1657_v63, %v1576_v25  ;;  %v1482_v31 = vadd.f32 %v6075_v38, %v1383_v58  ;;  %v1771_v1 = vadd.f32 %v1753_v43, %v1673_v52 }
 0x188   : > { %v1659_v19 = vpop.f32.mrf.mxu0  ;;  %v1579_v59 = vadd.f32 %v6076_v37, %v1481_v61  ;;  %v1581_v18 = vadd.f32 %v6078_v24, %v1483_v51  ;;  %v4656_v51 = vld [vmem:[%s6000_s3 + $0x70] ss:$8 sps:$4 sm:$0xff]   ;;  %v4688_v24 = vld [vmem:[%s6000_s3 + $0x24] ss:$8 sps:$4 sm:$0xff]  }
 0x189   : > { %v1578_v5 = vadd.f32 %v6074_v49, %v1480_v48  ;;  %v1675_v11 = vadd.f32 %v1659_v19, %v1577_v50  ;;  %v1772_v15 = vadd.f32 %v1755_v22, %v1674_v9  ;;  %v1580_v16 = vadd.f32 %v6077_v62, %v1482_v31  ;;  %v4674_v62 = vld [vmem:[%s6000_s3 + $0x40] ss:$8 sps:$4 sm:$0xff]   ;;  %v4725_v37 = vld [vmem:[%s6000_s3 + $0x130] ss:$8 sps:$4 sm:$0xff]  }
 0x18a   : > { %v1663_v29 = vpop.f32.mrf.mxu0  ;;  %v6079_v31 = vmov 0.0  }
 0x18b   : > { %v1676_v63 = vadd.f32 %v1663_v29, %v1578_v5  ;;  %v1773_v43 = vadd.f32 %v1757_v32, %v1675_v11  ;;  %v1767_v32 = vpop.f32.mrf.mxu1  ;;  %v4728_v11 = vld [vmem:[%s6000_s3 + $0x1b0] ss:$8 sps:$4 sm:$0xff]  }
 0x18c   : > { %v1665_v34 = vpop.f32.mrf.mxu0 }
 0x18d   : > { %v1677_v28 = vadd.f32 %v1665_v34, %v1579_v59  ;;  %v1774_v30 = vadd.f32 %v1761_v8, %v1676_v63  ;;  %v2010_v59 = vsel %vm2008_vm5, 1.0, %v6079_v31  ;;  %v4664_v63 = vld [vmem:[%s6000_s3 + $0x64] ss:$8 sps:$4 sm:$0xff]  }
 0x18e   : > { %v1667_v36 = vpop.f32.mrf.mxu0 }
 0x18f   : > { %v1678_v7 = vadd.f32 %v1667_v36, %v1580_v16  ;;  %v1775_v22 = vadd.f32 %v1763_v4, %v1677_v28  ;;  %v4662_v4 = vld [vmem:[%s6000_s3 + $0x60] ss:$8 sps:$4 sm:$0xff]   ;;  %v4673_v28 = vld [vmem:[%s6000_s3 + $0xc4] ss:$8 sps:$4 sm:$0xff]  }
 0x190   : > { %v1669_v12 = vpop.f32.mrf.mxu0  ;;  %v4671_v16 = vld [vmem:[%s6000_s3 + $0xc0] ss:$8 sps:$4 sm:$0xff]   ;;  %2221 = vmatprep.subr.bf16.mxu0 %v4673_v28 }
 0x191   : > { %v1679_v46 = vadd.f32 %v1669_v12, %v1581_v18  ;;  %v1776_v48 = vadd.f32 %v1765_v27, %v1678_v7  ;;  %2222 = vmatpush1.bf16.msra.mxu0 %v4671_v16  ;;  %v4686_v18 = vld [vmem:[%s6000_s3 + $0x20] ss:$8 sps:$4 sm:$0xff]   ;;  %v4694_v27 = vld [vmem:[%s6000_s3 + $0x14] ss:$8 sps:$4 sm:$0xff]   ;;  %v4745_v16 = vld [vmem:[%s6000_s3 + $0x104] ss:$8 sps:$4 sm:$0xff]  }
 0x192   : > { %v1849_v57 = vpop.f32.mrf.mxu0  ;;  %v4683_v7 = vld [vmem:[%s6000_s3 + $0xa0] ss:$8 sps:$4 sm:$0xff]  }
 0x193   : > { %v1868_v54 = vadd.f32 %v1849_v57, %v1770_v2  ;;  %v1777_v58 = vadd.f32 %v1767_v32, %v1679_v46  ;;  %v4706_v46 = vld [vmem:[%s6000_s3 + $0x1f4] ss:$8 sps:$4 sm:$0xff]   ;;  %v4746_v28 = vld [vmem:[%s6000_s3 + $0x180] ss:$8 sps:$4 sm:$0xff]  }
 0x194   : > { %v1851_v56 = vpop.f32.mrf.mxu0  ;;  %v4730_v57 = vld [vmem:[%s6000_s3 + $0x1b4] ss:$8 sps:$4 sm:$0xff]  }
 0x195   : > { %v1888_v41 = vadd.f32 %v1881_v33, %v1868_v54  ;;  %v1869_v17 = vadd.f32 %v1851_v56, %v1771_v1  ;;  %v1918_v1 = vsel %vm5291_vm3, 1.0, %v6079_v31  ;;  %v5451_v54 = vsel %vm2007_vm4, 1.0, %v6079_v31 }
 0x196   : > { %v1853_v40 = vpop.f32.mrf.mxu0  ;;  %v6084_v56 = vmov 0  }
 0x197   : > { %v1889_v19 = vadd.f32 %v1885_v14, %v1869_v17  ;;  %v1870_v3 = vadd.f32 %v1853_v40, %v1772_v15  ;;  %v1896_v6 = vmax.f32 %v1888_v41, 0.0  ;;  %v4670_v15 = vld [vmem:[%s6000_s3 + $0x54] ss:$8 sps:$4 sm:$0xff]   ;;  %v4668_v41 = vld [vmem:[%s6000_s3 + $0x50] ss:$8 sps:$4 sm:$0xff]  }
 0x198   : > { %v1855_v35 = vpop.f32.mrf.mxu0  ;;  %v4676_v17 = vld [vmem:[%s6000_s3 + $0x44] ss:$8 sps:$4 sm:$0xff]   ;;  %v4679_v40 = vld [vmem:[%s6000_s3 + $0xb4] ss:$8 sps:$4 sm:$0xff]  }
 0x199   : > { %v1897_v29 = vmax.f32 %v1889_v19, 0.0  ;;  %v1890_v20 = vadd.f32 %v1881_v33, %v1870_v3  ;;  %v1871_v39 = vadd.f32 %v1855_v35, %v1773_v43  ;;  %v4680_v43 = vld [vmem:[%s6000_s3 + $0x30] ss:$8 sps:$4 sm:$0xff]   ;;  %v4682_v3 = vld [vmem:[%s6000_s3 + $0x34] ss:$8 sps:$4 sm:$0xff]   ;;  %2223 = vmatprep.subr.bf16.mxu0 %v4679_v40 }
 0x19a   : > { %v1859_v45 = vpop.f32.mrf.mxu0  ;;  %v4677_v19 = vld [vmem:[%s6000_s3 + $0xb0] ss:$8 sps:$4 sm:$0xff]   ;;  %v4743_v40 = vld [vmem:[%s6000_s3 + $0x100] ss:$8 sps:$4 sm:$0xff]  }
 0x19b   : > { %v1904_v47 = vmax.f32 %v1896_v6, %v1897_v29  ;;  %v1891_v23 = vadd.f32 %v1885_v14, %v1871_v39  ;;  %v1872_v34 = vadd.f32 %v1859_v45, %v1774_v30  ;;  %v1898_v13 = vmax.f32 %v1890_v20, 0.0  ;;  %2224 = vmatpush1.bf16.msra.mxu0 %v4677_v19  ;;  %v4685_v30 = vld [vmem:[%s6000_s3 + $0xa4] ss:$8 sps:$4 sm:$0xff]   ;;  %v4692_v35 = vld [vmem:[%s6000_s3 + $0x10] ss:$8 sps:$4 sm:$0xff]  }
 0x19c   : > { %v1861_v0 = vpop.f32.mrf.mxu0  ;;  %2225 = vmatprep.subr.bf16.mxu0 %v4685_v30  ;;  %v4691_v6 = vld [vmem:[%s6000_s3 + $0x94] ss:$8 sps:$4 sm:$0xff]   ;;  %v4689_v29 = vld [vmem:[%s6000_s3 + $0x90] ss:$8 sps:$4 sm:$0xff]   ;;  %v4697_v20 = vld [vmem:[%s6000_s3 + $0x84] ss:$8 sps:$4 sm:$0xff]  }
 0x19d   : > { %v1899_v25 = vmax.f32 %v1891_v23, 0.0  ;;  %v1892_v52 = vadd.f32 %v1881_v33, %v1872_v34  ;;  %v1873_v42 = vadd.f32 %v1861_v0, %v1775_v22  ;;  %v4698_v39 = vld [vmem:[%s6000_s3] ss:$8 sps:$4 sm:$0xff]   ;;  %v4700_v22 = vld [vmem:[%s6000_s3 + $0x4] ss:$8 sps:$4 sm:$0xff]  }
 0x19e   : > { %v1863_v36 = vpop.f32.mrf.mxu0  ;;  %v4695_v45 = vld [vmem:[%s6000_s3 + $0x80] ss:$8 sps:$4 sm:$0xff]   ;;  %v4751_v19 = vld [vmem:[%s6000_s3 + $0x274] ss:$8 sps:$4 sm:$0xff]  }
 0x19f   : > { %v1905_v55 = vmax.f32 %v1898_v13, %v1899_v25  ;;  %v1893_v61 = vadd.f32 %v1885_v14, %v1873_v42  ;;  %v1874_v8 = vadd.f32 %v1863_v36, %v1776_v48  ;;  %v1900_v50 = vmax.f32 %v1892_v52, 0.0  ;;  %2226 = vmatpush1.bf16.msra.mxu0 %v4683_v7  ;;  %v4704_v25 = vld [vmem:[%s6000_s3 + $0x1f0] ss:$8 sps:$4 sm:$0xff]   ;;  %v4712_v36 = vld [vmem:[%s6000_s3 + $0x1e4] ss:$8 sps:$4 sm:$0xff]  }
 0x1a0   : > { %v1865_v21 = vpop.f32.mrf.mxu0  ;;  %2227 = vmatprep.subr.bf16.mxu0 %v4691_v6  ;;  %v4749_v7 = vld [vmem:[%s6000_s3 + $0x270] ss:$8 sps:$4 sm:$0xff]   ;;  %v4752_v6 = vld [vmem:[%s6000_s3 + $0x260] ss:$8 sps:$4 sm:$0xff]  }
 0x1a1   : > { %v1901_v2 = vmax.f32 %v1893_v61, 0.0  ;;  %v1894_v9 = vadd.f32 %v1881_v33, %v1874_v8  ;;  %v1875_v12 = vadd.f32 %v1865_v21, %v1777_v58  ;;  %v4701_v58 = vld [vmem:[%s6000_s3 + $0x170] ss:$8 sps:$4 sm:$0xff]   ;;  %v4709_v21 = vld [vmem:[%s6000_s3 + $0x164] ss:$8 sps:$4 sm:$0xff]  }
 0x1a2   : > { %v4727_v33 = vld [vmem:[%s6000_s3 + $0x134] ss:$8 sps:$4 sm:$0xff]  }
 0x1a3   : > { %v1906_v26 = vmax.f32 %v1900_v50, %v1901_v2  ;;  %v1895_v60 = vadd.f32 %v1885_v14, %v1875_v12  ;;  %v1902_v49 = vmax.f32 %v1894_v9, 0.0  ;;  %v4658_v14 = vld [vmem:[%s6000_s3 + $0x74] ss:$8 sps:$4 sm:$0xff]   ;;  %2228 = vmatpush1.bf16.msra.mxu0 %v4689_v29  ;;  %v4710_v50 = vld [vmem:[%s6000_s3 + $0x1e0] ss:$8 sps:$4 sm:$0xff]  }
 0x1a4   : > { %2229 = vmatprep.subr.bf16.mxu0 %v4697_v20  ;;  %v4718_v2 = vld [vmem:[%s6000_s3 + $0x1d4] ss:$8 sps:$4 sm:$0xff]   ;;  %v4707_v9 = vld [vmem:[%s6000_s3 + $0x160] ss:$8 sps:$4 sm:$0xff]   ;;  %v4755_v20 = vld [vmem:[%s6000_s3 + $0x250] ss:$8 sps:$4 sm:$0xff]  }
 0x1a5   : > { %v1903_v5 = vmax.f32 %v1895_v60, 0.0  ;;  %v4715_v12 = vld [vmem:[%s6000_s3 + $0x154] ss:$8 sps:$4 sm:$0xff]   ;;  %v4724_v60 = vld [vmem:[%s6000_s3 + $0x1c4] ss:$8 sps:$4 sm:$0xff]  }
 0x1a6   : > { %v4757_v29 = vld [vmem:[%s6000_s3 + $0x254] ss:$8 sps:$4 sm:$0xff]  }
 0x1a7   : > { %v1907_v38 = vmax.f32 %v1902_v49, %v1903_v5  ;;  %2230 = vmatpush1.bf16.msra.mxu0 %v4695_v45  ;;  %v4713_v49 = vld [vmem:[%s6000_s3 + $0x150] ss:$8 sps:$4 sm:$0xff]   ;;  %v4721_v5 = vld [vmem:[%s6000_s3 + $0x144] ss:$8 sps:$4 sm:$0xff]  }
 0x1a8   : > { %v4761_v45 = vld [vmem:[%s6000_s3 + $0x230] ss:$8 sps:$4 sm:$0xff]  }
 0x1a9   : > { %4322 = vmatprep.subr.msk.mxu1 %vm1926_vm6, %v1907_v38 }
 0x1aa   : > { %4323 = vmatpush3.msk.msra.mxu1 %vm1926_vm6, %v1907_v38 }
 0x1ab   : > { %4324 = vmatprep.subr.mxu1 %v1906_v26 }
 0x1ac   : > { %4325 = vmatpush3.msra.mxu1 %v1906_v26 }
 0x1ad   : > { %4326 = vmatprep.subr.mxu1 %v1905_v55 }
 0x1ae   : > { %4327 = vmatpush3.msra.mxu1 %v1905_v55 }
 0x1af   : > { %4328 = vmatprep.subr.mxu1 %v1904_v47 }
 0x1b0   : > { %4329 = vmatpush3.msra.mxu1 %v1904_v47 }
 0x1b1   : > { %4333 = vmatprep.subr.msk.mxu1 %vm1926_vm6, %v1907_v38  ;;  %4331 = vmatmul.mubr.msk.f32.vlgmr.msra.gmra.mxu1 %vm1919_vm2, %v1918_v1  ;;  %v4719_v1 = vld [vmem:[%s6000_s3 + $0x140] ss:$8 sps:$4 sm:$0xff]  }
 0x1b2   : > { %4334 = vmatpush3.msk.msra.mxu1 %vm1926_vm6, %v1907_v38  ;;  %4341 = vmatprep.mubr.msk.f32.mxu1 %vm1919_vm2, %v5451_v54  ;;  %v4722_v38 = vld [vmem:[%s6000_s3 + $0x1c0] ss:$8 sps:$4 sm:$0xff]  }
 0x1b3   : > { %4335 = vmatprep.subr.mxu1 %v1906_v26 }
 0x1b4   : > { %4336 = vmatpush3.msra.mxu1 %v1906_v26  ;;  %v4716_v26 = vld [vmem:[%s6000_s3 + $0x1d0] ss:$8 sps:$4 sm:$0xff]  }
 0x1b5   : > { %4337 = vmatprep.subr.mxu1 %v1905_v55 }
 0x1b6   : > { %4338 = vmatpush3.msra.mxu1 %v1905_v55 }
 0x1b7   : > { %4339 = vmatprep.subr.mxu1 %v1904_v47 }
 0x1b8   : > { %4340 = vmatpush3.msra.mxu1 %v1904_v47  ;;  %v4703_v47 = vld [vmem:[%s6000_s3 + $0x174] ss:$8 sps:$4 sm:$0xff]  }
 0x1b9   : > { %4342 = vmatmul.mubr.msk.f32.vlgmr.msra.gmra.mxu1 %vm1919_vm2, %v2010_v59  ;;  %2338 = vmatprep.subr.bf16.mxu1 %v4658_v14  ;;  %v4736_v14 = vld [vmem:[%s6000_s3 + $0x1a4] ss:$8 sps:$4 sm:$0xff]  }
 0x1ba   : > { %2339 = vmatpush1.bf16.msra.mxu1 %v4656_v51  ;;  %2370 = vmatprep.mubr.bf16.mxu1 %v6084_v56  ;;  %v4733_v59 = vld [vmem:[%s6000_s3 + $0x124] ss:$8 sps:$4 sm:$0xff]   ;;  %v4734_v51 = vld [vmem:[%s6000_s3 + $0x1a0] ss:$8 sps:$4 sm:$0xff]  }
 0x1bb   : > { %2340 = vmatprep.subr.bf16.mxu1 %v4664_v63  ;;  %2481 = vmatprep.subr.bf16.mxu0 %v4703_v47  ;;  %v4742_v63 = vld [vmem:[%s6000_s3 + $0x194] ss:$8 sps:$4 sm:$0xff]   ;;  %v4764_v47 = vld [vmem:[%s6000_s3 + $0x220] ss:$8 sps:$4 sm:$0xff]  }
 0x1be   : > { %2341 = vmatpush1.bf16.msra.mxu1 %v4662_v4  ;;  %v4731_v4 = vld [vmem:[%s6000_s3 + $0x120] ss:$8 sps:$4 sm:$0xff]  }
 0x1bf   : > { %2342 = vmatprep.subr.bf16.mxu1 %v4670_v15  ;;  %v4739_v15 = vld [vmem:[%s6000_s3 + $0x114] ss:$8 sps:$4 sm:$0xff]  }
 0x1c2   : > { %2343 = vmatpush1.bf16.msra.mxu1 %v4668_v41  ;;  %v4740_v41 = vld [vmem:[%s6000_s3 + $0x190] ss:$8 sps:$4 sm:$0xff]  }
 0x1c3   : > { %2344 = vmatprep.subr.bf16.mxu1 %v4676_v17  ;;  %v4748_v17 = vld [vmem:[%s6000_s3 + $0x184] ss:$8 sps:$4 sm:$0xff]  }
 0x1c6   : > { %2345 = vmatpush1.bf16.msra.mxu1 %v4674_v62  ;;  %v4737_v62 = vld [vmem:[%s6000_s3 + $0x110] ss:$8 sps:$4 sm:$0xff]  }
 0x1c7   : > { %2346 = vmatprep.subr.bf16.mxu1 %v4682_v3 }
 0x1ca   : > { %2347 = vmatpush1.bf16.msra.mxu1 %v4680_v43 }
 0x1cb   : > { %2348 = vmatprep.subr.bf16.mxu1 %v4688_v24 }
 0x1ce   : > { %2349 = vmatpush1.bf16.msra.mxu1 %v4686_v18 }
 0x1cf   : > { %2350 = vmatprep.subr.bf16.mxu1 %v4694_v27 }
 0x1d2   : > { %2351 = vmatpush1.bf16.msra.mxu1 %v4692_v35  ;;  %v4754_v35 = vld [vmem:[%s6000_s3 + $0x264] ss:$8 sps:$4 sm:$0xff]  }
 0x1d3   : > { %2352 = vmatprep.subr.bf16.mxu1 %v4700_v22  ;;  %v4763_v22 = vld [vmem:[%s6000_s3 + $0x234] ss:$8 sps:$4 sm:$0xff]  }
 0x1d6   : > { %2353 = vmatpush1.bf16.msra.mxu1 %v4698_v39  ;;  %v4760_v39 = vld [vmem:[%s6000_s3 + $0x244] ss:$8 sps:$4 sm:$0xff]  }
 0x1d7   : > { %2628 = vmatprep.subr.bf16.mxu1 %v4706_v46  ;;  %v4766_v46 = vld [vmem:[%s6000_s3 + $0x224] ss:$8 sps:$4 sm:$0xff]  }
 0x271   : > { %v4332_v23 = vpop.f32.mrf.mxu1 }
 0x273   : > { %v1996_v34 = vpop.f32.mrf.mxu1 }
 0x279   : > { %v4343_v48 = vpop.f32.mrf.mxu1 }
 0x27a   : > { %v2093_v32 = vmax.f32 %v4332_v23, %v4343_v48  ;;  %v4769_v23 = vld [vmem:[%s6000_s3 + $0x214] ss:$8 sps:$4 sm:$0xff]   ;;  %v4772_v48 = vld [vmem:[%s6000_s3 + $0x204] ss:$8 sps:$4 sm:$0xff]  }
 0x27b   : > { %v2083_v0 = vpop.f32.mrf.mxu1 }
 0x27c   : > { %2095 = vst [vmem:[#allocation2 + $0x8] sm:$0x3f] %v2093_v32  ;;  %v2092_v13 = vmax.f32 %v1996_v34, %v2083_v0  ;;  %v4767_v34 = vld [vmem:[%s6000_s3 + $0x210] ss:$8 sps:$4 sm:$0xff]   ;;  %v4770_v32 = vld [vmem:[%s6000_s3 + $0x200] ss:$8 sps:$4 sm:$0xff]  }
 0x27e   : > { %2094 = vst [vmem:[#allocation2] sm:$0xff] %v2092_v13 }
 0x283   : > { %v2097_v52 = vld [vmem:[#allocation2 + $0x8] sm:$0x3]  ;;  %v2529_v24 = vld [vmem:[#allocation2 + $0xb] sm:$0x3] }
 0x284   : > { %v2098_v42 = vpack.c.bf16 %v2097_v52, %v2092_v13  ;;  %v2116_v61 = vld [vmem:[#allocation2 + $0x9] sm:$0x3]  ;;  %v2676_v13 = vld [vmem:[#allocation2 + $0xc] sm:$0x3]  ;;  %v4774_v52 = vld [vmem:[%s6002_s5 + $0x38] sm:$0xff]  }
 0x285   : > { %v2115_v55 = vld [vmem:[#allocation2 + $0x1] sm:$0xff]  ;;  %v2382_v30 = vld [vmem:[#allocation2 + $0xa] sm:$0x3] }
 0x286   : > { %v2117_v8 = vpack.c.bf16 %v2116_v61, %v2115_v55  ;;  %2371 = vmatmul.mubr.bf16.vlgmr.msra.gmra.mxu1 %v2098_v42  ;;  %v2528_v43 = vld [vmem:[#allocation2 + $0x3] sm:$0xff]  ;;  %v4776_v42 = vld [vmem:[%s6002_s5 + $0x30] sm:$0xff]  }
 0x287   : > { %2629 = vmatpush1.bf16.msra.mxu1 %v4704_v25  ;;  %2660 = vmatprep.mubr.bf16.mxu1 %v6084_v56  ;;  %v2381_v3 = vld [vmem:[#allocation2 + $0x2] sm:$0xff]  ;;  %v2530_v18 = vpack.c.bf16 %v2529_v24, %v2528_v43 }
 0x288   : > { %2248 = vmatmul.mubr.bf16.vlgmr.msra.gmra.mxu0 %v2117_v8  ;;  %2630 = vmatprep.subr.bf16.mxu1 %v4712_v36  ;;  %v2383_v27 = vpack.c.bf16 %v2382_v30, %v2381_v3  ;;  %v2675_v0 = vld [vmem:[#allocation2 + $0x4] sm:$0xff] }
 0x289   : > { %2482 = vmatpush1.bf16.msra.mxu0 %v4701_v58  ;;  %2513 = vmatprep.mubr.bf16.mxu0 %v6084_v56  ;;  %v2677_v25 = vpack.c.bf16 %v2676_v13, %v2675_v0  ;;  %v4778_v36 = vld [vmem:[%s6002_s5 + $0x28] sm:$0xff]   ;;  %v4780_v58 = vld [vmem:[%s6002_s5 + $0x20] sm:$0xff]   ;;  %v4783_v0 = vld [vmem:[%s6002_s5 + $0x50] sm:$0xff]  }
 0x28a   : > { %2483 = vmatprep.subr.bf16.mxu0 %v4709_v21  ;;  %v4784_v13 = vld [vmem:[%s6002_s5 + $0x10] sm:$0xff]  }
 0x28b   : > { %2631 = vmatpush1.bf16.msra.mxu1 %v4710_v50 }
 0x28c   : > { %2632 = vmatprep.subr.bf16.mxu1 %v4718_v2 }
 0x28d   : > { %2484 = vmatpush1.bf16.msra.mxu0 %v4707_v9 }
 0x28e   : > { %2485 = vmatprep.subr.bf16.mxu0 %v4715_v12 }
 0x28f   : > { %2633 = vmatpush1.bf16.msra.mxu1 %v4716_v26 }
 0x290   : > { %2634 = vmatprep.subr.bf16.mxu1 %v4724_v60 }
 0x291   : > { %2486 = vmatpush1.bf16.msra.mxu0 %v4713_v49 }
 0x292   : > { %2487 = vmatprep.subr.bf16.mxu0 %v4721_v5 }
 0x293   : > { %2635 = vmatpush1.bf16.msra.mxu1 %v4722_v38 }
 0x294   : > { %2636 = vmatprep.subr.bf16.mxu1 %v4730_v57 }
 0x295   : > { %2488 = vmatpush1.bf16.msra.mxu0 %v4719_v1 }
 0x296   : > { %2489 = vmatprep.subr.bf16.mxu0 %v4727_v33 }
 0x297   : > { %2637 = vmatpush1.bf16.msra.mxu1 %v4728_v11 }
 0x298   : > { %2638 = vmatprep.subr.bf16.mxu1 %v4736_v14 }
 0x299   : > { %2490 = vmatpush1.bf16.msra.mxu0 %v4725_v37 }
 0x29a   : > { %2491 = vmatprep.subr.bf16.mxu0 %v4733_v59 }
 0x29b   : > { %2639 = vmatpush1.bf16.msra.mxu1 %v4734_v51 }
 0x29c   : > { %2640 = vmatprep.subr.bf16.mxu1 %v4742_v63 }
 0x29d   : > { %2492 = vmatpush1.bf16.msra.mxu0 %v4731_v4 }
 0x29e   : > { %2493 = vmatprep.subr.bf16.mxu0 %v4739_v15 }
 0x29f   : > { %2641 = vmatpush1.bf16.msra.mxu1 %v4740_v41 }
 0x2a0   : > { %2642 = vmatprep.subr.bf16.mxu1 %v4748_v17  ;;  %v2822_v17 = vld [vmem:[%s6001_s4] sm:$0x3] }
 0x2a1   : > { %2494 = vmatpush1.bf16.msra.mxu0 %v4737_v62  ;;  %v2831_v43 = vrot.slane %v2822_v17, %v1884_v53  ;;  %v2827_v30 = vrot.slane %v2822_v17, %v1880_v10  ;;  %v4773_v10 = vld [vmem:[%s6002_s5 + $0x78] sm:$0xff]  }
 0x2a2   : > { %2495 = vmatprep.subr.bf16.mxu0 %v4745_v16 }
 0x2a3   : > { %2643 = vmatpush1.bf16.msra.mxu1 %v4746_v28 }
 0x2a4   : > { %4344 = vmatprep.subr.mxu1 %v6079_v31 }
 0x2a5   : > { %2496 = vmatpush1.bf16.msra.mxu0 %v4743_v40 }
 0x2a6   : > { %2661 = vmatmul.mubr.bf16.vlgmr.msra.gmra.mxu1 %v2530_v18  ;;  %2775 = vmatprep.subr.bf16.mxu0 %v4751_v19 }
 0x2a7   : > { %4348 = vmatprep.mubr.msk.f32.mxu1 %vm4957_vm7, %v6079_v31 }
 0x2a8   : > { %2514 = vmatmul.mubr.bf16.vlgmr.msra.gmra.mxu0 %v2383_v27 }
 0x2a9   : > { %2776 = vmatpush1.bf16.msra.mxu0 %v4749_v7  ;;  %2807 = vmatprep.mubr.bf16.mxu0 %v6084_v56  ;;  %v4758_v56 = vld [vmem:[%s6000_s3 + $0x240] ss:$8 sps:$4 sm:$0xff]  }
 0x2aa   : > { %2777 = vmatprep.subr.bf16.mxu0 %v4754_v35 }
 0x2ad   : > { %2778 = vmatpush1.bf16.msra.mxu0 %v4752_v6 }
 0x2ae   : > { %2779 = vmatprep.subr.bf16.mxu0 %v4757_v29 }
 0x2b1   : > { %2780 = vmatpush1.bf16.msra.mxu0 %v4755_v20 }
 0x2b2   : > { %2781 = vmatprep.subr.bf16.mxu0 %v4760_v39 }
 0x2b5   : > { %2782 = vmatpush1.bf16.msra.mxu0 %v4758_v56 }
 0x2b6   : > { %2783 = vmatprep.subr.bf16.mxu0 %v4763_v22 }
 0x2b9   : > { %2784 = vmatpush1.bf16.msra.mxu0 %v4761_v45 }
 0x2ba   : > { %2785 = vmatprep.subr.bf16.mxu0 %v4766_v46 }
 0x2bd   : > { %2786 = vmatpush1.bf16.msra.mxu0 %v4764_v47 }
 0x2be   : > { %2787 = vmatprep.subr.bf16.mxu0 %v4769_v23  ;;  %v4775_v23 = vld [vmem:[%s6002_s5 + $0x70] sm:$0xff]  }
 0x2c1   : > { %2788 = vmatpush1.bf16.msra.mxu0 %v4767_v34  ;;  %v4777_v34 = vld [vmem:[%s6002_s5 + $0x68] sm:$0xff]  }
 0x2c2   : > { %2789 = vmatprep.subr.bf16.mxu0 %v4772_v48  ;;  %v4781_v48 = vld [vmem:[%s6002_s5 + $0x58] sm:$0xff]  }
 0x2c5   : > { %2790 = vmatpush1.bf16.msra.mxu0 %v4770_v32  ;;  %v4782_v32 = vld [vmem:[%s6002_s5 + $0x18] sm:$0xff]  }
 0x2c6   : > { %4378 = vmatprep.subr.bf16.mxu0 %v6079_v31 }
 0x2c8   : > { %2808 = vmatmul.mubr.bf16.vlgmr.msra.gmra.mxu0 %v2677_v25  ;;  %v4785_v25 = vld [vmem:[%s6002_s5 + $0x48] sm:$0xff]  }
 0x2c9   : > { %4394 = vmatprep.mubr.msk.bf16.mxu0 %vm4957_vm7, %v6079_v31  ;;  %4379 = vmatpush3.bf16.msra.mxu0 %v4774_v52  ;;  %v4786_v52 = vld [vmem:[%s6002_s5 + $0x8] sm:$0xff]  }
 0x2ca   : > { %4380 = vmatprep.subr.bf16.mxu0 %v6079_v31 }
 0x2cd   : > { %4381 = vmatpush3.bf16.msra.mxu0 %v4776_v42  ;;  %v4787_v42 = vld [vmem:[%s6002_s5 + $0x40] sm:$0xff]  }
 0x2ce   : > { %4382 = vmatprep.subr.bf16.mxu0 %v6079_v31 }
 0x2d1   : > { %4383 = vmatpush3.bf16.msra.mxu0 %v4778_v36  ;;  %v4788_v36 = vld [vmem:[%s6002_s5] sm:$0xff]  }
 0x2d2   : > { %4384 = vmatprep.subr.bf16.mxu0 %v6079_v31 }
 0x2d5   : > { %4385 = vmatpush3.bf16.msra.mxu0 %v4780_v58 }
 0x2d6   : > { %4386 = vmatprep.subr.bf16.mxu0 %v6079_v31 }
 0x2d9   : > { %4387 = vmatpush3.bf16.msra.mxu0 %v4782_v32 }
 0x2da   : > { %4388 = vmatprep.subr.bf16.mxu0 %v6079_v31 }
 0x2dd   : > { %4389 = vmatpush3.bf16.msra.mxu0 %v4784_v13 }
 0x2de   : > { %4390 = vmatprep.subr.bf16.mxu0 %v6079_v31 }
 0x2e1   : > { %4391 = vmatpush3.bf16.msra.mxu0 %v4786_v52 }
 0x2e2   : > { %4392 = vmatprep.subr.bf16.mxu0 %v6079_v31 }
 0x2e5   : > { %4393 = vmatpush3.bf16.msra.mxu0 %v4788_v36 }
 0x2e6   : > { %4418 = vmatprep.subr.bf16.mxu0 %v6079_v31 }
 0x346   : > { %v2372_v8 = vpop.f32.mrf.mxu1 }
 0x348   : > { %v2249_v55 = vpop.f32.mrf.mxu0  ;;  %v2374_v50 = vpop.f32.mrf.mxu1 }
 0x349   : > { %v2373_v1 = vadd.f32 %v2372_v8, %v2249_v55 }
 0x34a   : > { %v2251_v61 = vpop.f32.mrf.mxu0  ;;  %v2376_v9 = vpop.f32.mrf.mxu1 }
 0x34b   : > { %v2375_v38 = vadd.f32 %v2374_v50, %v2251_v61  ;;  %v4789_v50 = vld [vmem:[%s6002_s5 + $0xb8] sm:$0xff]  }
 0x34c   : > { %v2253_v21 = vpop.f32.mrf.mxu0  ;;  %v2378_v26 = vpop.f32.mrf.mxu1 }
 0x34d   : > { %v2377_v33 = vadd.f32 %v2376_v9, %v2253_v21 }
 0x34e   : > { %v2255_v2 = vpop.f32.mrf.mxu0 }
 0x34f   : > { %v2379_v37 = vadd.f32 %v2378_v26, %v2255_v2 }
 0x366   : > { %v2662_v49 = vpop.f32.mrf.mxu1 }
 0x368   : > { %v2515_v12 = vpop.f32.mrf.mxu0  ;;  %v2664_v57 = vpop.f32.mrf.mxu1 }
 0x369   : > { %v2524_v59 = vadd.f32 %v2515_v12, %v2373_v1  ;;  %v4790_v12 = vld [vmem:[%s6002_s5 + $0xf8] sm:$0xff]   ;;  %v4795_v1 = vld [vmem:[%s6002_s5 + $0xa0] sm:$0xff]  }
 0x36a   : > { %v2517_v60 = vpop.f32.mrf.mxu0  ;;  %v2666_v63 = vpop.f32.mrf.mxu1 }
 0x36b   : > { %v2525_v11 = vadd.f32 %v2517_v60, %v2375_v38  ;;  %v2671_v16 = vadd.f32 %v2662_v49, %v2524_v59  ;;  %v4791_v49 = vld [vmem:[%s6002_s5 + $0xb0] sm:$0xff]   ;;  %v4793_v38 = vld [vmem:[%s6002_s5 + $0xa8] sm:$0xff]  }
 0x36c   : > { %v2519_v5 = vpop.f32.mrf.mxu0  ;;  %v2668_v19 = vpop.f32.mrf.mxu1  ;;  %v4800_v59 = vld [vmem:[%s6002_s5 + $0xd0] sm:$0xff]  }
 0x36d   : > { %v2526_v51 = vadd.f32 %v2519_v5, %v2377_v33  ;;  %v2672_v15 = vadd.f32 %v2664_v57, %v2525_v11  ;;  %v4792_v5 = vld [vmem:[%s6002_s5 + $0xf0] sm:$0xff]   ;;  %v4794_v57 = vld [vmem:[%s6002_s5 + $0xe8] sm:$0xff]   ;;  %v4796_v33 = vld [vmem:[%s6002_s5 + $0xe0] sm:$0xff]  }
 0x36e   : > { %v2521_v14 = vpop.f32.mrf.mxu0  ;;  %v4797_v11 = vld [vmem:[%s6002_s5 + $0x98] sm:$0xff]  }
 0x36f   : > { %v2527_v41 = vadd.f32 %v2521_v14, %v2379_v37  ;;  %v2673_v28 = vadd.f32 %v2666_v63, %v2526_v51  ;;  %v4798_v14 = vld [vmem:[%s6002_s5 + $0xd8] sm:$0xff]   ;;  %v4799_v37 = vld [vmem:[%s6002_s5 + $0x90] sm:$0xff]   ;;  %v4801_v51 = vld [vmem:[%s6002_s5 + $0x88] sm:$0xff]  }
 0x370   : > { %v4802_v63 = vld [vmem:[%s6002_s5 + $0xc8] sm:$0xff]  }
 0x371   : > { %v2674_v24 = vadd.f32 %v2668_v19, %v2527_v41  ;;  %v4808_v19 = vld [vmem:[%s6002_s5 + $0x120] sm:$0xff]  }
 0x388   : > { %v2809_v4 = vpop.f32.mrf.mxu0 }
 0x389   : > { %v2818_v18 = vadd.f32 %v2809_v4, %v2671_v16  ;;  %v4803_v4 = vld [vmem:[%s6002_s5 + $0x80] sm:$0xff]  }
 0x38a   : > { %v2811_v62 = vpop.f32.mrf.mxu0 }
 0x38b   : > { %v2819_v40 = vadd.f32 %v2811_v62, %v2672_v15  ;;  %v2834_v20 = vadd.f32 %v2827_v30, %v2818_v18  ;;  %v4804_v15 = vld [vmem:[%s6002_s5 + $0xc0] sm:$0xff]   ;;  %v4805_v62 = vld [vmem:[%s6002_s5 + $0x138] sm:$0xff]   ;;  %v4811_v18 = vld [vmem:[%s6002_s5 + $0x108] sm:$0xff]  }
 0x38c   : > { %v2813_v3 = vpop.f32.mrf.mxu0 }
 0x38d   : > { %v2820_v7 = vadd.f32 %v2813_v3, %v2673_v28  ;;  %v2835_v35 = vadd.f32 %v2831_v43, %v2819_v40  ;;  %v2838_v46 = vmax.f32 %v2834_v20, 0.0  ;;  %v4806_v40 = vld [vmem:[%s6002_s5 + $0x130] sm:$0xff]   ;;  %v4809_v3 = vld [vmem:[%s6002_s5 + $0x118] sm:$0xff]   ;;  %v4815_v20 = vld [vmem:[%s6004_s7 + $0x28] sm:$0xff]  }
 0x38e   : > { %v2815_v27 = vpop.f32.mrf.mxu0 }
 0x38f   : > { %v2836_v6 = vadd.f32 %v2827_v30, %v2820_v7  ;;  %v2821_v29 = vadd.f32 %v2815_v27, %v2674_v24  ;;  %v2839_v56 = vmax.f32 %v2835_v35, 0.0  ;;  %v4810_v24 = vld [vmem:[%s6002_s5 + $0x110] sm:$0xff]   ;;  %v4812_v30 = vld [vmem:[%s6002_s5 + $0x100] sm:$0xff]   ;;  %v4813_v35 = vld [vmem:[%s6004_s7 + $0x38] ss:$0 sps:$4 sm:$0xff]  }
 0x391   : > { %v2837_v39 = vadd.f32 %v2831_v43, %v2821_v29  ;;  %v2840_v22 = vmax.f32 %v2836_v6, 0.0  ;;  %v2842_v47 = vmax.f32 %v2838_v46, %v2839_v56  ;;  %v4807_v43 = vld [vmem:[%s6002_s5 + $0x128] sm:$0xff]   ;;  %v3602_v6 = vsel %vm1926_vm6, %v4813_v35, 0  ;;  %v4814_v29 = vld [vmem:[%s6004_s7 + $0x30] sm:$0xff]   ;;  %v4817_v56 = vld [vmem:[%s6004_s7 + $0x18] sm:$0xff]  }
 0x392   : > { %v4820_v46 = vld [vmem:[%s6004_s7] sm:$0xff]  }
 0x393   : > { %v2841_v45 = vmax.f32 %v2837_v39, 0.0  ;;  %v4816_v39 = vld [vmem:[%s6004_s7 + $0x20] sm:$0xff]  }
 0x395   : > { %v2843_v53 = vmax.f32 %v2840_v22, %v2841_v45  ;;  %v4818_v22 = vld [vmem:[%s6004_s7 + $0x10] sm:$0xff]   ;;  %v4819_v45 = vld [vmem:[%s6004_s7 + $0x8] sm:$0xff]  }
 0x397   : > { %4345 = vmatpush3.msk.msra.mxu1 %vm2847_vm8, %v2843_v53 }
 0x398   : > { %4346 = vmatprep.subr.mxu1 %v6079_v31 }
 0x399   : > { %4347 = vmatpush3.msra.mxu1 %v2842_v47 }
 0x39a   : > { %4349 = vmatmul.mubr.msk.f32.vlgmr.msra.gmra.mxu1 %vm2844_vm9, %v6085_v44  ;;  %4351 = vmatprep.subr.mxu1 %v6079_v31  ;;  %v4822_v44 = vld [vmem:[%s6006_s9 + $0x20] sm:$0xff]  }
 0x39b   : > { %4352 = vmatpush3.msk.msra.mxu1 %vm2847_vm8, %v2843_v53  ;;  %4355 = vmatprep.mubr.msk.f32.mxu1 %vm4957_vm7, %v6079_v31  ;;  %v4821_v53 = vld [vmem:[%s6006_s9 + $0x28] ss:$0 sps:$4 sm:$0x33]  }
 0x39c   : > { %4353 = vmatprep.subr.mxu1 %v6079_v31 }
 0x39d   : > { %4354 = vmatpush3.msra.mxu1 %v2842_v47  ;;  %v3696_v47 = vsel %vm2847_vm8, %v4821_v53, 0 }
 0x39e   : > { %4356 = vmatmul.mubr.msk.f32.vlgmr.msra.gmra.mxu1 %vm2844_vm9, %v5451_v54  ;;  %4358 = vmatprep.subr.bf16.mxu1 %v6079_v31  ;;  %v4779_v54 = vld [vmem:[%s6002_s5 + $0x60] sm:$0xff]  }
 0x39f   : > { %4359 = vmatpush3.bf16.msra.mxu1 %v4773_v10  ;;  %4374 = vmatprep.mubr.msk.bf16.mxu1 %vm4957_vm7, %v6079_v31  ;;  %v4823_v10 = vld [vmem:[%s6006_s9 + $0x18] sm:$0xff]  }
 0x3a0   : > { %4360 = vmatprep.subr.bf16.mxu1 %v6079_v31 }
 0x3a3   : > { %4361 = vmatpush3.bf16.msra.mxu1 %v4775_v23  ;;  %v4824_v23 = vld [vmem:[%s6006_s9 + $0x10] sm:$0xff]  }
 0x3a4   : > { %4362 = vmatprep.subr.bf16.mxu1 %v6079_v31 }
 0x3a7   : > { %4363 = vmatpush3.bf16.msra.mxu1 %v4777_v34 }
 0x3a8   : > { %4364 = vmatprep.subr.bf16.mxu1 %v6079_v31 }
 0x3ab   : > { %4365 = vmatpush3.bf16.msra.mxu1 %v4779_v54 }
 0x3ac   : > { %4366 = vmatprep.subr.bf16.mxu1 %v6079_v31 }
 0x3af   : > { %4367 = vmatpush3.bf16.msra.mxu1 %v4781_v48 }
 0x3b0   : > { %4368 = vmatprep.subr.bf16.mxu1 %v6079_v31 }
 0x3b3   : > { %4369 = vmatpush3.bf16.msra.mxu1 %v4783_v0 }
 0x3b4   : > { %4370 = vmatprep.subr.bf16.mxu1 %v6079_v31 }
 0x3b7   : > { %4371 = vmatpush3.bf16.msra.mxu1 %v4785_v25 }
 0x3b8   : > { %4372 = vmatprep.subr.bf16.mxu1 %v6079_v31 }
 0x3bb   : > { %4373 = vmatpush3.bf16.msra.mxu1 %v4787_v42 }
 0x3bc   : > { %4398 = vmatprep.subr.bf16.mxu1 %v6079_v31 }
 0x45a   : > { %v2917_v58 = vpop.f32.mrf.mxu1 }
 0x45c   : > { %v4350_v55 = vpop.f32.mrf.mxu1 }
 0x45e   : > { %v2989_v61 = vpop.f32.mrf.mxu1 }
 0x45f   : > { %v2993_v8 = vmax.f32 %v2917_v58, %v2989_v61 }
 0x460   : > { %v4357_v21 = vpop.f32.mrf.mxu1 }
 0x461   : > { %2994 = vst [vmem:[#allocation3] sm:$0x1f] %v2993_v8 }
 0x468   : > { %v3013_v2 = vld [vmem:[#allocation3 + $0x1] sm:$0x1]  ;;  %v2995_v9 = vld [vmem:[#allocation3] sm:$0x1]  ;;  %v3208_v41 = vld [vmem:[#allocation3 + $0x2] sm:$0x1] }
 0x469   : > { %v3014_v26 = vpack.c.bf16 %v3013_v2, %v3013_v2  ;;  %v2996_v60 = vpack.c.bf16 %v2995_v9, %v2995_v9  ;;  %v3316_v17 = vld [vmem:[#allocation3 + $0x3] sm:$0x1]  ;;  %v3209_v16 = vpack.c.bf16 %v3208_v41, %v3208_v41  ;;  %v3424_v7 = vld [vmem:[#allocation3 + $0x4] sm:$0x1] }
 0x46a   : > { %v3317_v28 = vpack.c.bf16 %v3316_v17, %v3316_v17  ;;  %v3425_v27 = vpack.c.bf16 %v3424_v7, %v3424_v7 }
 0x46b   : > { %4375 = vmatmul.mubr.bf16.vlgmr.msra.gmra.mxu1 %v3014_v26  ;;  %4395 = vmatmul.mubr.bf16.vlgmr.msra.gmra.mxu0 %v2996_v60  ;;  %v3532_v60 = vld [vmem:[%s6003_s6] sm:$0x1] }
 0x46c   : > { %4399 = vmatpush3.bf16.msra.mxu1 %v4789_v50  ;;  %4419 = vmatpush3.bf16.msra.mxu0 %v4790_v12 }
 0x46d   : > { %4400 = vmatprep.subr.bf16.mxu1 %v6079_v31  ;;  %4420 = vmatprep.subr.bf16.mxu0 %v6079_v31 }
 0x46e   : > { %4414 = vmatprep.mubr.msk.bf16.mxu1 %vm4957_vm7, %v6079_v31  ;;  %4434 = vmatprep.mubr.msk.bf16.mxu0 %vm4957_vm7, %v6079_v31 }
 0x470   : > { %4401 = vmatpush3.bf16.msra.mxu1 %v4791_v49  ;;  %4421 = vmatpush3.bf16.msra.mxu0 %v4792_v5 }
 0x471   : > { %4402 = vmatprep.subr.bf16.mxu1 %v6079_v31  ;;  %4422 = vmatprep.subr.bf16.mxu0 %v6079_v31 }
 0x474   : > { %4403 = vmatpush3.bf16.msra.mxu1 %v4793_v38  ;;  %4423 = vmatpush3.bf16.msra.mxu0 %v4794_v57 }
 0x475   : > { %4404 = vmatprep.subr.bf16.mxu1 %v6079_v31  ;;  %4424 = vmatprep.subr.bf16.mxu0 %v6079_v31 }
 0x478   : > { %4405 = vmatpush3.bf16.msra.mxu1 %v4795_v1  ;;  %4425 = vmatpush3.bf16.msra.mxu0 %v4796_v33 }
 0x479   : > { %4406 = vmatprep.subr.bf16.mxu1 %v6079_v31  ;;  %4426 = vmatprep.subr.bf16.mxu0 %v6079_v31 }
 0x47c   : > { %4407 = vmatpush3.bf16.msra.mxu1 %v4797_v11  ;;  %4427 = vmatpush3.bf16.msra.mxu0 %v4798_v14  ;;  %v4825_v14 = vld [vmem:[%s6006_s9 + $0x8] sm:$0xff]  }
 0x47d   : > { %4408 = vmatprep.subr.bf16.mxu1 %v6079_v31  ;;  %4428 = vmatprep.subr.bf16.mxu0 %v6079_v31 }
 0x480   : > { %4409 = vmatpush3.bf16.msra.mxu1 %v4799_v37  ;;  %4429 = vmatpush3.bf16.msra.mxu0 %v4800_v59  ;;  %v4826_v37 = vld [vmem:[%s6006_s9] sm:$0xff]  }
 0x481   : > { %4410 = vmatprep.subr.bf16.mxu1 %v6079_v31  ;;  %4430 = vmatprep.subr.bf16.mxu0 %v6079_v31  ;;  %v3551_v59 = vld [vmem:[%s6005_s8] sm:$0x1] }
 0x484   : > { %4411 = vmatpush3.bf16.msra.mxu1 %v4801_v51  ;;  %4431 = vmatpush3.bf16.msra.mxu0 %v4802_v63 }
 0x485   : > { %4412 = vmatprep.subr.bf16.mxu1 %v6079_v31  ;;  %4432 = vmatprep.subr.bf16.mxu0 %v6079_v31 }
 0x488   : > { %4413 = vmatpush3.bf16.msra.mxu1 %v4803_v4  ;;  %4433 = vmatpush3.bf16.msra.mxu0 %v4804_v15 }
 0x489   : > { %4438 = vmatprep.subr.bf16.mxu1 %v6079_v31  ;;  %4458 = vmatprep.subr.bf16.mxu0 %v6079_v31 }
 0x48b   : > { %4415 = vmatmul.mubr.bf16.vlgmr.msra.gmra.mxu1 %v3209_v16  ;;  %4435 = vmatmul.mubr.bf16.vlgmr.msra.gmra.mxu0 %v3317_v28 }
 0x48c   : > { %4439 = vmatpush3.bf16.msra.mxu1 %v4805_v62  ;;  %4454 = vmatprep.mubr.msk.bf16.mxu1 %vm4957_vm7, %v6079_v31 }
 0x48d   : > { %4440 = vmatprep.subr.bf16.mxu1 %v6079_v31  ;;  %4474 = vmatprep.mubr.msk.bf16.mxu0 %vm4957_vm7, %v6079_v31 }
 0x48e   : > { %4459 = vmatpush3.bf16.msra.mxu0 %v3602_v6 }
 0x48f   : > { %4460 = vmatprep.subr.bf16.mxu0 %v6079_v31 }
 0x490   : > { %4441 = vmatpush3.bf16.msra.mxu1 %v4806_v40 }
 0x491   : > { %4442 = vmatprep.subr.bf16.mxu1 %v6079_v31 }
 0x492   : > { %4461 = vmatpush3.bf16.msra.mxu0 %v4814_v29 }
 0x493   : > { %4462 = vmatprep.subr.bf16.mxu0 %v6079_v31 }
 0x494   : > { %4443 = vmatpush3.bf16.msra.mxu1 %v4807_v43 }
 0x495   : > { %4444 = vmatprep.subr.bf16.mxu1 %v6079_v31 }
 0x496   : > { %4463 = vmatpush3.bf16.msra.mxu0 %v4815_v20 }
 0x497   : > { %4464 = vmatprep.subr.bf16.mxu0 %v6079_v31 }
 0x498   : > { %4445 = vmatpush3.bf16.msra.mxu1 %v4808_v19 }
 0x499   : > { %4446 = vmatprep.subr.bf16.mxu1 %v6079_v31 }
 0x49a   : > { %4465 = vmatpush3.bf16.msra.mxu0 %v4816_v39 }
 0x49b   : > { %4466 = vmatprep.subr.bf16.mxu0 %v6079_v31 }
 0x49c   : > { %4447 = vmatpush3.bf16.msra.mxu1 %v4809_v3 }
 0x49d   : > { %4448 = vmatprep.subr.bf16.mxu1 %v6079_v31 }
 0x49e   : > { %4467 = vmatpush3.bf16.msra.mxu0 %v4817_v56 }
 0x49f   : > { %4468 = vmatprep.subr.bf16.mxu0 %v6079_v31 }
 0x4a0   : > { %4449 = vmatpush3.bf16.msra.mxu1 %v4810_v24 }
 0x4a1   : > { %4450 = vmatprep.subr.bf16.mxu1 %v6079_v31 }
 0x4a2   : > { %4469 = vmatpush3.bf16.msra.mxu0 %v4818_v22 }
 0x4a3   : > { %4470 = vmatprep.subr.bf16.mxu0 %v6079_v31 }
 0x4a4   : > { %4451 = vmatpush3.bf16.msra.mxu1 %v4811_v18 }
 0x4a5   : > { %4452 = vmatprep.subr.bf16.mxu1 %v6079_v31 }
 0x4a6   : > { %4471 = vmatpush3.bf16.msra.mxu0 %v4819_v45 }
 0x4a7   : > { %4472 = vmatprep.subr.bf16.mxu0 %v6079_v31 }
 0x4a8   : > { %4453 = vmatpush3.bf16.msra.mxu1 %v4812_v30 }
 0x4a9   : > { %4478 = vmatprep.subr.bf16.mxu1 %v6079_v31 }
 0x4aa   : > { %4473 = vmatpush3.bf16.msra.mxu0 %v4820_v46 }
 0x4ab   : > { %4455 = vmatmul.mubr.bf16.vlgmr.msra.gmra.mxu1 %v3425_v27 }
 0x4ac   : > { %4490 = vmatprep.mubr.msk.bf16.mxu1 %vm4957_vm7, %v6079_v31  ;;  %4479 = vmatpush3.bf16.msra.mxu1 %v3696_v47 }
 0x4ad   : > { %4480 = vmatprep.subr.bf16.mxu1 %v6079_v31 }
 0x4b0   : > { %4481 = vmatpush3.bf16.msra.mxu1 %v4822_v44 }
 0x4b1   : > { %4482 = vmatprep.subr.bf16.mxu1 %v6079_v31 }
 0x4b4   : > { %4483 = vmatpush3.bf16.msra.mxu1 %v4823_v10 }
 0x4b5   : > { %4484 = vmatprep.subr.bf16.mxu1 %v6079_v31 }
 0x4b8   : > { %4485 = vmatpush3.bf16.msra.mxu1 %v4824_v23 }
 0x4b9   : > { %4486 = vmatprep.subr.bf16.mxu1 %v6079_v31 }
 0x4bc   : > { %4487 = vmatpush3.bf16.msra.mxu1 %v4825_v14 }
 0x4bd   : > { %4488 = vmatprep.subr.bf16.mxu1 %v6079_v31  ;;  %v3657_v31 = vld [vmem:[%s6007_s10] sm:$0x1] }
 0x4c0   : > { %4489 = vmatpush3.bf16.msra.mxu1 %v4826_v37 }
 0x52b   : > { %v3114_v34 = vpop.f32.mrf.mxu1  ;;  %v3202_v54 = vpop.f32.mrf.mxu0 }
 0x52c   : > { %v3203_v2 = vadd.f32 %v3202_v54, %v3114_v34 }
 0x52d   : > { %v4376_v48 = vpop.f32.mrf.mxu1  ;;  %v4396_v32 = vpop.f32.mrf.mxu0 }
 0x52f   : > { %v3117_v0 = vpop.f32.mrf.mxu1  ;;  %v3205_v13 = vpop.f32.mrf.mxu0 }
 0x531   : > { %v4377_v25 = vpop.f32.mrf.mxu1  ;;  %v4397_v52 = vpop.f32.mrf.mxu0 }
 0x54b   : > { %v3309_v42 = vpop.f32.mrf.mxu1  ;;  %v3417_v36 = vpop.f32.mrf.mxu0 }
 0x54c   : > { %v3315_v9 = vadd.f32 %v3309_v42, %v3203_v2 }
 0x54d   : > { %v4416_v58 = vpop.f32.mrf.mxu1  ;;  %v4436_v55 = vpop.f32.mrf.mxu0 }
 0x54e   : > { %v3423_v12 = vadd.f32 %v3417_v36, %v3315_v9 }
 0x54f   : > { %v3312_v61 = vpop.f32.mrf.mxu1  ;;  %v3420_v8 = vpop.f32.mrf.mxu0 }
 0x551   : > { %v4417_v21 = vpop.f32.mrf.mxu1  ;;  %v4437_v50 = vpop.f32.mrf.mxu0 }
 0x56b   : > { %v3525_v26 = vpop.f32.mrf.mxu1 }
 0x56c   : > { %v3531_v49 = vadd.f32 %v3525_v26, %v3423_v12 }
 0x56d   : > { %v4456_v5 = vpop.f32.mrf.mxu1 }
 0x56e   : > { %v3533_v38 = vadd.f32 %v3532_v60, %v3531_v49 }
 0x56f   : > { %v3528_v57 = vpop.f32.mrf.mxu1 }
 0x570   : > { %v3534_v1 = vmax.f32 %v3533_v38, 0.0 }
 0x571   : > { %v4457_v33 = vpop.f32.mrf.mxu1 }
 0x572   : > { %v3535_v11 = vpack.c.bf16 %v3534_v1, %v3534_v1 }
 0x574   : > { %4475 = vmatmul.mubr.msk.bf16.vlgmr.msra.gmra.mxu0 %vm3597_vm10, %v3535_v11 }
 0x634   : > { %v3638_v51 = vpop.f32.mrf.mxu0 }
 0x635   : > { %v3639_v63 = vadd.f32 %v3638_v51, %v3551_v59 }
 0x636   : > { %v4476_v4 = vpop.f32.mrf.mxu0 }
 0x637   : > { %v3644_v15 = vmax.f32 %v3639_v63, 0.0 }
 0x638   : > { %v3641_v41 = vpop.f32.mrf.mxu0 }
 0x639   : > { %v3645_v17 = vpack.c.bf16 %v3644_v15, %v3644_v15 }
 0x63a   : > { %v4477_v62 = vpop.f32.mrf.mxu0 }
 0x63b   : > { %4491 = vmatmul.mubr.msk.bf16.vlgmr.msra.gmra.mxu1 %vm3691_vm11, %v3645_v17 }
 0x6fb   : > { %v3732_v16 = vpop.f32.mrf.mxu1 }
 0x6fc   : > { %v3733_v28 = vadd.f32 %v3732_v16, %v3657_v31 }
 0x6fd   : > { %v4492_v40 = vpop.f32.mrf.mxu1 }
 0x6fe   : > { %3739 = vst.msk [vmem:[%s418_s24] sm:$0x1] %vm3738_vm12, %v3733_v28 }
 0x6ff   : > { %v3735_v43 = vpop.f32.mrf.mxu1 }
 0x700   : > { %4894 = shalt.err (!%p4891_p0)
}
 0x701   : > { %s4895_s1 = scalar_lea.hbm %s5954_s14, 16  ;;  %s4899_s26 = scalar_lea.hbm %s6008_s11, 32 }
 0x702   : > { %p4896_p11 = scmp.ne.s32.totalorder %s5954_s14, %s4895_s1  ;;  %p4900_p4 = scmp.lt.s32.totalorder %s5954_s14, %s6008_s11 }
 0x703   : > { %p4901_p6 = scmp.lt.s32.totalorder %s4899_s26, %s4895_s1 }
 0x704   : > { %p4897_p2 = pnand %p4896_p11, %p6086_p5 }
 0x705   : > { %p4902_p8 = por %p4901_p6, %p4900_p4 }
 0x706   : > { %p4898_p1 = pneg %p4897_p2 }
 0x708   : > { %p4903_p3 = pnand %p4902_p8, %p4898_p1 }
 0x70a   : > { %4906 = shalt.err (!%p4903_p3)
}
 0x70b   : > { %4507 = dma.vmem_to_hbm [thread:$0]  (%p6086_p5), %s5956_s17, 16, %s5954_s14, %s3741_s16   ;;  %v4493_v19 = vpop.f32.mrf.mxu1 }
 0x70c PF: > { %s6087_s24 = sld [smem:[#allocation13_spill]]  ;;  %p6090_p9 = scmp.ge.s32.totalorder %s4949_s20, 2 }
 0x70d   : > { %s6088_s23 = sld [smem:[#allocation14_spill]] }
 0x712   : > { %s3765_s25 = sand.u32 1, %s6087_s24  }
 0x713   : > { %p6089_p7 = scmp.ne.s32.totalorder %s6088_s23, 0  ;;  %s3766_s21 = scalar_lea.sflag [#allocation6], %s3765_s25 }
 0x715   : > { %p4518_p10 = pnand %p6090_p9, %p6089_p7 }
 0x717   : > { %p4519_p12 = pneg %p4518_p10 }
 0x719   : > { %4932 = dma.done.wait (%p4519_p12), %s3766_s21, 16  }
 0x71a   : > { %4934 = vsyncadd (%p4519_p12), %s3766_s21, 4294967280  ;;  %s6091_s20 = sld [smem:[#allocation15_spill]]  ;;  %s6093_s17 = smov %s4941_s18 }
 0x71b   : > { %s6092_s13 = sld [smem:[#allocation16_spill]]  ;;  %s6094_s18 = smov %s4945_s19 }
 0x720   : > { %p25_p13 = scmp.ge.s32.totalorder %s6091_s20, 4  }
 0x721   : > { %s6095_s19 = smov %s6092_s13 }
 0x722   :  { %27 = sbr.rel (!%p25_p13) target bundleno = 8 (0x8), region = 137 }
 0x727   :  { %3770 = vsyncpa [#allocation5], 1 }
 0x728   :  { %3772 = vsyncpa [#allocation5 + $0x1], 1 }
 0x729   :  { %3773 = vsyncpa [#allocation8], 1 }
 0x72a   :  { %3774 = vsyncpa [#allocation6], 1 }
 0x72b   :  { %3776 = vsyncpa [#allocation6 + $0x1], 1 }

</bundles_post_ra>
